<compile_context>
chip_gen: v7x
topology: tpu7x:2x2x1
jax: 0.10.0
libtpu: 0.0.40
codegen_flags: <defaults>
</compile_context>

<pallas_src>
import jax
import jax.numpy as jnp
from jax.experimental import pallas as pl
from jax.experimental.pallas import tpu as pltpu

CHN_MID = 32
EPS = 0.1
NEG_SLOPE = 0.2
LANE = 128
SUBLANES = 8


def dist2logit_kernel(d0_ref, d1_ref,
                      w1_ref, b1_ref,
                      w2_ref, b2_ref,
                      w3_ref, b3_ref,
                      o_ref):
    cdt = w1_ref.dtype  # matmul-operand dtype (bf16); all other math is f32

    # ---- dense channel build on the full (8, TM) block ----------------------
    d0 = d0_ref[...]                                       # (8, TM) f32
    d1 = d1_ref[...]                                       # (8, TM) f32
    r0 = d0 * pl.reciprocal(d1 + EPS, approx=True)         # EUP slot, dense
    r1 = d1 * pl.reciprocal(d0 + EPS, approx=True)
    # sublane-aligned concat of four (8, TM) blocks -> s = 8*c_in + g layout
    x = jnp.concatenate([d0, d1, r0, r1], axis=0).astype(cdt)   # (32, TM)

    # ---- conv1 (4 -> 32, group-packed) + LeakyReLU ---------------------------
    h = jnp.dot(w1_ref[...], x, preferred_element_type=jnp.float32)
    h = h + b1_ref[...]                                    # (256, TM) f32
    h = jnp.maximum(h, NEG_SLOPE * h)
    h = h.astype(cdt)

    # ---- conv2 (32 -> 32, group-packed, 256x256 stationary) + LeakyReLU -----
    h = jnp.dot(w2_ref[...], h, preferred_element_type=jnp.float32)
    h = h + b2_ref[...]                                    # (256, TM) f32
    h = jnp.maximum(h, NEG_SLOPE * h)

    # ---- conv3 (32 -> 1) on the VPU + sublane tree-reduce (MXU stays free) --
    t = h * w3_ref[...]                                    # (256, TM) f32
    n = t.shape[0]
    while n > SUBLANES:                                    # 256->128->...->8
        n //= 2
        t = t[:n, :] + t[n:, :]                            # fold keeps s mod 8
    z = t + b3_ref[...]                                    # (8, TM) f32

    # ---- sigmoid + one dense store ------------------------------------------
    o_ref[...] = jax.nn.sigmoid(z).astype(o_ref.dtype)


def _pack_weight(w):
    """(Cout, Cin) -> (8*Cout, 8*Cin) replicated-diagonal weight.

    Wp[8*o + g, 8*i + g'] = w[o, i] if g == g' else 0, matching the
    channel-major / group-minor (s = 8*c + g) activation layout.
    """
    co, ci = w.shape
    eye = jnp.eye(SUBLANES, dtype=w.dtype)
    return jnp.einsum('oi,gh->ogih', w, eye).reshape(co * SUBLANES,
                                                     ci * SUBLANES)


def dist2logit_forward(d0, d1, params, *, tile_m=1024,
                       matmul_dtype=jnp.bfloat16):
    """d0, d1: (N, 1, H, W) float32. Returns (N, 1, H, W) float32.

    tile_m is the lane width per grid step (sweepable; 512-2048 is the
    expected sweet spot). MXU operands use `matmul_dtype` (bf16 on every TPU
    generation); accumulation and elementwise math stay f32.
    """
    N, C, H, W = d0.shape
    assert C == 1
    assert tile_m % LANE == 0, "tile_m must be a multiple of 128 lanes"
    M = N * H * W

    # Lane/sublane-dense layout: pixels packed into (8, M8).
    m8_min = pl.cdiv(M, SUBLANES)
    m8_round = pl.cdiv(m8_min, LANE) * LANE
    tile = min(tile_m, m8_round)
    # Feed both v7x TensorCores: ensure >= 2 grid steps whenever possible.
    if tile >= m8_round and m8_round >= 2 * LANE:
        tile = pl.cdiv(m8_round, 2 * LANE) * LANE
    n_tiles = pl.cdiv(m8_round, tile)
    M8 = n_tiles * tile
    M_pad = SUBLANES * M8

    def to_dense(a):
        flat = a.reshape(M)
        if M_pad != M:                       # skip the pad copy when it tiles
            flat = jnp.pad(flat, (0, M_pad - M))
        return flat.reshape(SUBLANES, M8)

    d0_d = to_dense(d0)
    d1_d = to_dense(d1)

    w1, b1, w2, b2, w3, b3 = params
    # Fold the linear (d0 - d1) channel into conv1 (K: 5 -> 4), exact:
    # x5 = [d0, d1, d0-d1, r0, r1]  ->  x4 = [d0, d1, r0, r1].
    w1_eff = jnp.stack([w1[:, 0] + w1[:, 2],
                        w1[:, 1] - w1[:, 2],
                        w1[:, 3],
                        w1[:, 4]], axis=1)                     # (32, 4)

    w1_p = _pack_weight(w1_eff).astype(matmul_dtype)           # (256, 32)
    w2_p = _pack_weight(w2).astype(matmul_dtype)               # (256, 256)
    b1_p = jnp.repeat(b1, SUBLANES, axis=0)                    # (256, 1) f32
    b2_p = jnp.repeat(b2, SUBLANES, axis=0)                    # (256, 1) f32
    w3_p = jnp.repeat(w3.reshape(-1, 1), SUBLANES, axis=0)     # (256, 1) f32
    b3_p = b3.reshape(1, 1)                                    # (1, 1)   f32

    full = lambda shape: pl.BlockSpec(shape, lambda i: (0, 0))

    out_dense = pl.pallas_call(
        dist2logit_kernel,
        out_shape=jax.ShapeDtypeStruct((SUBLANES, M8), jnp.float32),
        grid_spec=pltpu.PrefetchScalarGridSpec(
            num_scalar_prefetch=0,
            grid=(n_tiles,),
            in_specs=[
                pl.BlockSpec((SUBLANES, tile), lambda i: (0, i)),   # d0
                pl.BlockSpec((SUBLANES, tile), lambda i: (0, i)),   # d1
                full(w1_p.shape), full(b1_p.shape),
                full(w2_p.shape), full(b2_p.shape),
                full(w3_p.shape), full(b3_p.shape),
            ],
            out_specs=pl.BlockSpec((SUBLANES, tile), lambda i: (0, i)),
        ),
        compiler_params=pltpu.CompilerParams(
            dimension_semantics=("parallel",)),
    )(d0_d, d1_d, w1_p, b1_p, w2_p, b2_p, w3_p, b3_p)

    if M_pad != M:
        out_flat = out_dense.reshape(M_pad)[:M]
    else:
        out_flat = out_dense.reshape(M)
    return out_flat.reshape(N, 1, H, W)


def init_params(key, chn_mid=CHN_MID):
    """Deterministic synthetic init matching Conv2d(k=1) param shapes.

    PyTorch weights are (C_out, C_in, 1, 1); stored here as (C_out, C_in),
    biases as (C_out, 1).
    """
    k1, k2, k3, k4, k5, k6 = jax.random.split(key, 6)
    w1 = jax.random.normal(k1, (chn_mid, 5), jnp.float32) * 0.2
    b1 = jax.random.normal(k2, (chn_mid, 1), jnp.float32) * 0.05
    w2 = jax.random.normal(k3, (chn_mid, chn_mid), jnp.float32) * 0.1
    b2 = jax.random.normal(k4, (chn_mid, 1), jnp.float32) * 0.05
    w3 = jax.random.normal(k5, (1, chn_mid), jnp.float32) * 0.1
    b3 = jax.random.normal(k6, (1, 1), jnp.float32) * 0.05
    return (w1, b1, w2, b2, w3, b3)


def reference_forward(d0, d1, params, eps=EPS):
    """Pure-JAX f32 reference reproducing the PyTorch semantics (NCHW, 1x1)."""
    w1, b1, w2, b2, w3, b3 = params
    x = jnp.concatenate(
        [d0, d1, d0 - d1, d0 / (d1 + eps), d1 / (d0 + eps)], axis=1)

    def conv1x1(x, w, b):
        return jnp.einsum('nchw,oc->nohw', x, w) + b.reshape(1, -1, 1, 1)

    h = jax.nn.leaky_relu(conv1x1(x, w1, b1), NEG_SLOPE)
    h = jax.nn.leaky_relu(conv1x1(h, w2, b2), NEG_SLOPE)
    return jax.nn.sigmoid(conv1x1(h, w3, b3))


if __name__ == "__main__":
    key = jax.random.PRNGKey(0)
    kp, kd0, kd1 = jax.random.split(key, 3)

    N, H, W = 2, 16, 16
    # distances are non-negative in LPIPS; abs keeps the divisions benign
    d0 = jnp.abs(jax.random.normal(kd0, (N, 1, H, W), jnp.float32))
    d1 = jnp.abs(jax.random.normal(kd1, (N, 1, H, W), jnp.float32))

    params = init_params(kp)

    fwd = jax.jit(lambda a, b: dist2logit_forward(a, b, params))
    out = jax.block_until_ready(fwd(d0, d1))

    ref = reference_forward(d0, d1, params)
    assert out.shape == (N, 1, H, W)

    # Tolerance loosened vs the f32 reference: bf16 MXU operands + EUP approx
    # reciprocal. Sigmoid outputs in [0,1] tolerate this easily for LPIPS.
    tol = 3e-2
    assert jnp.allclose(out, ref, atol=tol, rtol=tol), "mismatch vs reference"

    print("KERNEL_OK")
</pallas_src>

<mosaic_0001>
module attributes {stable_mosaic.version = 11 : i64} {
  func.func @dist2logit_kernel(%arg0: i32, %arg1: memref<8x128xf32, #tpu.memory_space<vmem>>, %arg2: memref<8x128xf32, #tpu.memory_space<vmem>>, %arg3: memref<256x32xbf16, #tpu.memory_space<vmem>>, %arg4: memref<256x1xf32, #tpu.memory_space<vmem>>, %arg5: memref<256x256xbf16, #tpu.memory_space<vmem>>, %arg6: memref<256x1xf32, #tpu.memory_space<vmem>>, %arg7: memref<256x1xf32, #tpu.memory_space<vmem>>, %arg8: memref<1x1xf32, #tpu.memory_space<vmem>>, %arg9: memref<8x128xf32, #tpu.memory_space<vmem>>) attributes {dimension_semantics = [#tpu.dimension_semantics<parallel>], iteration_bounds = array<i64: 1>, scalar_prefetch = 0 : i64, scratch_operands = 0 : i64, tpu.core_type = #tpu.core_type<tc>, window_params = [{transform_indices = @transform_0, window_bounds = array<i64: 8, 128>}, {transform_indices = @transform_1, window_bounds = array<i64: 8, 128>}, {pipeline_mode = #tpu.pipeline_mode<synchronous>, transform_indices = @transform_2, window_bounds = array<i64: 256, 32>}, {pipeline_mode = #tpu.pipeline_mode<synchronous>, transform_indices = @transform_3, window_bounds = array<i64: 256, 1>}, {pipeline_mode = #tpu.pipeline_mode<synchronous>, transform_indices = @transform_4, window_bounds = array<i64: 256, 256>}, {pipeline_mode = #tpu.pipeline_mode<synchronous>, transform_indices = @transform_5, window_bounds = array<i64: 256, 1>}, {pipeline_mode = #tpu.pipeline_mode<synchronous>, transform_indices = @transform_6, window_bounds = array<i64: 256, 1>}, {pipeline_mode = #tpu.pipeline_mode<synchronous>, transform_indices = @transform_7, window_bounds = array<i64: 1, 1>}, {transform_indices = @transform_8, window_bounds = array<i64: 8, 128>}]} {
    %c0 = arith.constant 0 : index
    %c0_0 = arith.constant 0 : index
    %0 = vector.load %arg1[%c0, %c0_0] : memref<8x128xf32, #tpu.memory_space<vmem>>, vector<8x128xf32>
    %c0_1 = arith.constant 0 : index
    %c0_2 = arith.constant 0 : index
    %1 = vector.load %arg2[%c0_1, %c0_2] : memref<8x128xf32, #tpu.memory_space<vmem>>, vector<8x128xf32>
    %cst = arith.constant 1.000000e-01 : f32
    %2 = vector.broadcast %cst : f32 to vector<8x128xf32>
    %3 = arith.addf %1, %2 : vector<8x128xf32>
    %4 = tpu.reciprocal %3 {approx = true} : vector<8x128xf32> -> vector<8x128xf32>
    %5 = arith.mulf %0, %4 : vector<8x128xf32>
    %cst_3 = arith.constant 1.000000e-01 : f32
    %6 = vector.broadcast %cst_3 : f32 to vector<8x128xf32>
    %7 = arith.addf %0, %6 : vector<8x128xf32>
    %8 = tpu.reciprocal %7 {approx = true} : vector<8x128xf32> -> vector<8x128xf32>
    %9 = arith.mulf %1, %8 : vector<8x128xf32>
    %10 = tpu.concatenate %0, %1, %5, %9 in 0 : vector<8x128xf32>, vector<8x128xf32>, vector<8x128xf32>, vector<8x128xf32> -> vector<32x128xf32>
    %11 = arith.truncf %10 : vector<32x128xf32> to vector<32x128xbf16>
    %c0_4 = arith.constant 0 : index
    %c0_5 = arith.constant 0 : index
    %12 = vector.load %arg3[%c0_4, %c0_5] : memref<256x32xbf16, #tpu.memory_space<vmem>>, vector<256x32xbf16>
    %cst_6 = arith.constant dense<0.000000e+00> : vector<256x128xf32>
    %13 = tpu.matmul %12, %11, %cst_6 {dimension_numbers = #tpu.dot_dimension_numbers<[1], [0], [0], [1], [0, 0, 1, 1], [], []>} : vector<256x32xbf16>, vector<32x128xbf16>, vector<256x128xf32> -> vector<256x128xf32>
    %c0_7 = arith.constant 0 : index
    %c0_8 = arith.constant 0 : index
    %14 = vector.load %arg4[%c0_7, %c0_8] : memref<256x1xf32, #tpu.memory_space<vmem>>, vector<256x1xf32>
    %15 = vector.broadcast %14 : vector<256x1xf32> to vector<256x128xf32>
    %16 = arith.addf %13, %15 : vector<256x128xf32>
    %cst_9 = arith.constant 2.000000e-01 : f32
    %17 = vector.broadcast %cst_9 : f32 to vector<256x128xf32>
    %18 = arith.mulf %17, %16 : vector<256x128xf32>
    %19 = arith.maximumf %16, %18 : vector<256x128xf32>
    %20 = arith.truncf %19 : vector<256x128xf32> to vector<256x128xbf16>
    %c0_10 = arith.constant 0 : index
    %c0_11 = arith.constant 0 : index
    %21 = vector.load %arg5[%c0_10, %c0_11] : memref<256x256xbf16, #tpu.memory_space<vmem>>, vector<256x256xbf16>
    %cst_12 = arith.constant dense<0.000000e+00> : vector<256x128xf32>
    %22 = tpu.matmul %21, %20, %cst_12 {dimension_numbers = #tpu.dot_dimension_numbers<[1], [0], [0], [1], [0, 0, 1, 1], [], []>} : vector<256x256xbf16>, vector<256x128xbf16>, vector<256x128xf32> -> vector<256x128xf32>
    %c0_13 = arith.constant 0 : index
    %c0_14 = arith.constant 0 : index
    %23 = vector.load %arg6[%c0_13, %c0_14] : memref<256x1xf32, #tpu.memory_space<vmem>>, vector<256x1xf32>
    %24 = vector.broadcast %23 : vector<256x1xf32> to vector<256x128xf32>
    %25 = arith.addf %22, %24 : vector<256x128xf32>
    %cst_15 = arith.constant 2.000000e-01 : f32
    %26 = vector.broadcast %cst_15 : f32 to vector<256x128xf32>
    %27 = arith.mulf %26, %25 : vector<256x128xf32>
    %28 = arith.maximumf %25, %27 : vector<256x128xf32>
    %c0_16 = arith.constant 0 : index
    %c0_17 = arith.constant 0 : index
    %29 = vector.load %arg7[%c0_16, %c0_17] : memref<256x1xf32, #tpu.memory_space<vmem>>, vector<256x1xf32>
    %30 = vector.broadcast %29 : vector<256x1xf32> to vector<256x128xf32>
    %31 = arith.mulf %28, %30 : vector<256x128xf32>
    %32 = vector.extract_strided_slice %31 {offsets = [0, 0], sizes = [128, 128], strides = [1, 1]} : vector<256x128xf32> to vector<128x128xf32>
    %33 = vector.extract_strided_slice %31 {offsets = [128, 0], sizes = [128, 128], strides = [1, 1]} : vector<256x128xf32> to vector<128x128xf32>
    %34 = arith.addf %32, %33 : vector<128x128xf32>
    %35 = vector.extract_strided_slice %34 {offsets = [0, 0], sizes = [64, 128], strides = [1, 1]} : vector<128x128xf32> to vector<64x128xf32>
    %36 = vector.extract_strided_slice %34 {offsets = [64, 0], sizes = [64, 128], strides = [1, 1]} : vector<128x128xf32> to vector<64x128xf32>
    %37 = arith.addf %35, %36 : vector<64x128xf32>
    %38 = vector.extract_strided_slice %37 {offsets = [0, 0], sizes = [32, 128], strides = [1, 1]} : vector<64x128xf32> to vector<32x128xf32>
    %39 = vector.extract_strided_slice %37 {offsets = [32, 0], sizes = [32, 128], strides = [1, 1]} : vector<64x128xf32> to vector<32x128xf32>
    %40 = arith.addf %38, %39 : vector<32x128xf32>
    %41 = vector.extract_strided_slice %40 {offsets = [0, 0], sizes = [16, 128], strides = [1, 1]} : vector<32x128xf32> to vector<16x128xf32>
    %42 = vector.extract_strided_slice %40 {offsets = [16, 0], sizes = [16, 128], strides = [1, 1]} : vector<32x128xf32> to vector<16x128xf32>
    %43 = arith.addf %41, %42 : vector<16x128xf32>
    %44 = vector.extract_strided_slice %43 {offsets = [0, 0], sizes = [8, 128], strides = [1, 1]} : vector<16x128xf32> to vector<8x128xf32>
    %45 = vector.extract_strided_slice %43 {offsets = [8, 0], sizes = [8, 128], strides = [1, 1]} : vector<16x128xf32> to vector<8x128xf32>
    %46 = arith.addf %44, %45 : vector<8x128xf32>
    %c0_18 = arith.constant 0 : index
    %c0_19 = arith.constant 0 : index
    %47 = vector.load %arg8[%c0_18, %c0_19] : memref<1x1xf32, #tpu.memory_space<vmem>>, vector<1x1xf32>
    %48 = vector.broadcast %47 : vector<1x1xf32> to vector<8x128xf32>
    %49 = arith.addf %46, %48 : vector<8x128xf32>
    %50 = arith.negf %49 : vector<8x128xf32>
    %51 = math.exp %50 : vector<8x128xf32>
    %cst_20 = arith.constant 1.000000e+00 : f32
    %52 = vector.broadcast %cst_20 : f32 to vector<8x128xf32>
    %53 = arith.addf %52, %51 : vector<8x128xf32>
    %54 = arith.divf %52, %53 : vector<8x128xf32>
    %c0_21 = arith.constant 0 : index
    %c0_22 = arith.constant 0 : index
    %55 = vector.load %arg9[%c0_21, %c0_22] : memref<8x128xf32, #tpu.memory_space<vmem>>, vector<8x128xf32>
    tpu.vector_store %arg9[%c0_21, %c0_22], %54 {strides = array<i32>} : memref<8x128xf32, #tpu.memory_space<vmem>>, vector<8x128xf32>,
    return
  }
  func.func @transform_0(%arg0: i32) -> (i32, i32) {
    %c0_i32 = arith.constant 0 : i32
    %c0_i32_0 = arith.constant 0 : i32
    return %c0_i32, %arg0 : i32, i32
  }
  func.func @transform_1(%arg0: i32) -> (i32, i32) {
    %c0_i32 = arith.constant 0 : i32
    %c0_i32_0 = arith.constant 0 : i32
    return %c0_i32, %arg0 : i32, i32
  }
  func.func @transform_2(%arg0: i32) -> (i32, i32) {
    %c0_i32 = arith.constant 0 : i32
    %c0_i32_0 = arith.constant 0 : i32
    %c0_i32_1 = arith.constant 0 : i32
    return %c0_i32, %c0_i32_0 : i32, i32
  }
  func.func @transform_3(%arg0: i32) -> (i32, i32) {
    %c0_i32 = arith.constant 0 : i32
    %c0_i32_0 = arith.constant 0 : i32
    %c0_i32_1 = arith.constant 0 : i32
    return %c0_i32, %c0_i32_0 : i32, i32
  }
  func.func @transform_4(%arg0: i32) -> (i32, i32) {
    %c0_i32 = arith.constant 0 : i32
    %c0_i32_0 = arith.constant 0 : i32
    %c0_i32_1 = arith.constant 0 : i32
    return %c0_i32, %c0_i32_0 : i32, i32
  }
  func.func @transform_5(%arg0: i32) -> (i32, i32) {
    %c0_i32 = arith.constant 0 : i32
    %c0_i32_0 = arith.constant 0 : i32
    %c0_i32_1 = arith.constant 0 : i32
    return %c0_i32, %c0_i32_0 : i32, i32
  }
  func.func @transform_6(%arg0: i32) -> (i32, i32) {
    %c0_i32 = arith.constant 0 : i32
    %c0_i32_0 = arith.constant 0 : i32
    %c0_i32_1 = arith.constant 0 : i32
    return %c0_i32, %c0_i32_0 : i32, i32
  }
  func.func @transform_7(%arg0: i32) -> (i32, i32) {
    %c0_i32 = arith.constant 0 : i32
    %c0_i32_0 = arith.constant 0 : i32
    %c0_i32_1 = arith.constant 0 : i32
    return %c0_i32, %c0_i32_0 : i32, i32
  }
  func.func @transform_8(%arg0: i32) -> (i32, i32) {
    %c0_i32 = arith.constant 0 : i32
    %c0_i32_0 = arith.constant 0 : i32
    return %c0_i32, %arg0 : i32, i32
  }
}

</mosaic_0001>

<bundles_post_ra>
// kernel: _lambda_.1
= control target key start
LH: loop header
LB: loop body
LE: loop exit
PB: predicated region body
PF: predicated region fallthrough
CT: control target
= control target key end

     0   :  { %v1845_v0 = vmov 0   ;;  %vm346_vm0 = vcmask 261120   ;;  %s2626_s3 = inlined_call_operand.vmem [shape: f32[256,1], index: 3, kind: input, shape index: {}]   ;;  %s2627_s0 = inlined_call_operand.vmem [shape: f32[8,128], index: 0, kind: input, shape index: {}]   ;;  %s2628_s1 = inlined_call_operand.vmem [shape: f32[8,128], index: 1, kind: input, shape index: {}]   ;;  %s2629_s2 = inlined_call_operand.vmem [shape: bf16[256,32], index: 2, kind: input, shape index: {}]   ;;  %s2630_s7 = inlined_call_operand.<no memory space> [shape: f32[1,1], index: 7, kind: input, shape index: {}]   ;;  %s2631_s5 = inlined_call_operand.vmem [shape: f32[256,1], index: 5, kind: input, shape index: {}]   ;;  %s2632_s6 = inlined_call_operand.vmem [shape: f32[256,1], index: 6, kind: input, shape index: {}]   ;;  %s2633_s4 = inlined_call_operand.vmem [shape: bf16[256,256], index: 4, kind: input, shape index: {}]   ;;  %s2634_s8 = inlined_call_operand.vmem [shape: f32[8,128], index: 8, kind: output, shape index: {}]  }
   0x1   :  { %1772 = vset.pattern.permute.xlu1 %v1845_v0  ;;  %1771 = vset.pattern.permute.xlu0 %v1845_v0  ;;  %v90_v1 = vld [vmem:[%s2626_s3 + $0x80] sm:$0xff]  ;;  %v91_v3 = vld [vmem:[%s2626_s3 + $0x88] sm:$0xff]  ;;  %v92_v11 = vld [vmem:[%s2626_s3 + $0x90] sm:$0xff]  ;;  %v13_v54 = vstv %s2630_s7 }
   0x2   :  { %v74_v2 = vld [vmem:[%s2626_s3] sm:$0xff]  ;;  %188 = vperm.xlu0 %1771, %v90_v1   ;;  %v75_v4 = vld [vmem:[%s2626_s3 + $0x8] sm:$0xff]  ;;  %v93_v12 = vld [vmem:[%s2626_s3 + $0x98] sm:$0xff]  ;;  %14 = vst [vmem:[#allocation2] sm:$0x1] %v13_v54 }
   0x3   :  { %108 = vperm.xlu1 %1772, %v74_v2   ;;  %v32_v5 = vld [vmem:[%s2627_s0] sm:$0xff]  ;;  %v76_v13 = vld [vmem:[%s2626_s3 + $0x10] sm:$0xff]  ;;  %v77_v14 = vld [vmem:[%s2626_s3 + $0x18] sm:$0xff] }
   0x4   :  { %v33_v6 = vld [vmem:[%s2628_s1] sm:$0xff]  ;;  %v37_v7 = vadd.f32 0.1, %v32_v5  ;;  %v95_v16 = vld [vmem:[%s2626_s3 + $0xa8] sm:$0xff]  ;;  %v96_v25 = vld [vmem:[%s2626_s3 + $0xb0] sm:$0xff] }
   0x5   :  { %v34_v8 = vadd.f32 0.1, %v33_v6  ;;  %v40_v9 = vpack.c.bf16 %v33_v6, %v32_v5  ;;  %v1773_v10 = vld [vmem:[%s2629_s2] sm:$0xff]   ;;  %v79_v23 = vld [vmem:[%s2626_s3 + $0x28] sm:$0xff]  ;;  %v1775_v26 = vld [vmem:[%s2629_s2 + $0x10] sm:$0xff]  }
   0x6   :  { %193 = vperm.xlu0 %1771, %v91_v3   ;;  %1837 = vrcp.f32 %v37_v7  ;;  %1722 = vmatprep.mubr.msk.bf16.mxu0 %vm346_vm0, %v1773_v10  ;;  %v94_v15 = vld [vmem:[%s2626_s3 + $0xa0] sm:$0xff]  ;;  %v1774_v24 = vld [vmem:[%s2629_s2 + $0x8] sm:$0xff]   ;;  %v97_v27 = vld [vmem:[%s2626_s3 + $0xb8] sm:$0xff] }
   0x7   :  { %113 = vperm.xlu1 %1772, %v75_v4   ;;  %1839 = vrcp.f32 %v34_v8  ;;  %1718 = vmatprep.subr.bf16.mxu0 %v40_v9  ;;  %v78_v21 = vld [vmem:[%s2626_s3 + $0x20] sm:$0xff]  ;;  %v80_v28 = vld [vmem:[%s2626_s3 + $0x30] sm:$0xff]  ;;  %v81_v29 = vld [vmem:[%s2626_s3 + $0x38] sm:$0xff] }
   0x8   :  { %1719 = vmatpush3.bf16.msra.mxu0 %v40_v9  ;;  %v1776_v30 = vld [vmem:[%s2629_s2 + $0x18] sm:$0xff]   ;;  %v98_v31 = vld [vmem:[%s2626_s3 + $0xc0] sm:$0xff]  ;;  %v99_v33 = vld [vmem:[%s2626_s3 + $0xc8] sm:$0xff] }
   0x9   :  { %v1777_v32 = vld [vmem:[%s2629_s2 + $0x20] sm:$0xff]   ;;  %v83_v35 = vld [vmem:[%s2626_s3 + $0x48] sm:$0xff]  ;;  %v100_v37 = vld [vmem:[%s2626_s3 + $0xd0] sm:$0xff] }
   0xa   :  { %198 = vperm.xlu0 %1771, %v92_v11   ;;  %v82_v34 = vld [vmem:[%s2626_s3 + $0x40] sm:$0xff]  ;;  %v1778_v36 = vld [vmem:[%s2629_s2 + $0x28] sm:$0xff]   ;;  %v1779_v38 = vld [vmem:[%s2629_s2 + $0x30] sm:$0xff]  }
   0xb   :  { %203 = vperm.xlu1 %1772, %v93_v12   ;;  %v101_v39 = vld [vmem:[%s2626_s3 + $0xd8] sm:$0xff]  ;;  %v84_v40 = vld [vmem:[%s2626_s3 + $0x50] sm:$0xff]  ;;  %v102_v43 = vld [vmem:[%s2626_s3 + $0xe0] sm:$0xff] }
   0xc   :  { %v85_v41 = vld [vmem:[%s2626_s3 + $0x58] sm:$0xff]  ;;  %v1781_v44 = vld [vmem:[%s2629_s2 + $0x40] sm:$0xff]   ;;  %v103_v45 = vld [vmem:[%s2626_s3 + $0xe8] sm:$0xff] }
   0xd   :  { %v1780_v42 = vld [vmem:[%s2629_s2 + $0x38] sm:$0xff]   ;;  %v86_v46 = vld [vmem:[%s2626_s3 + $0x60] sm:$0xff]  ;;  %v87_v47 = vld [vmem:[%s2626_s3 + $0x68] sm:$0xff] }
   0xe   :  { %118 = vperm.xlu0 %1771, %v76_v13   ;;  %v1782_v48 = vld [vmem:[%s2629_s2 + $0x48] sm:$0xff]   ;;  %v104_v49 = vld [vmem:[%s2626_s3 + $0xf0] sm:$0xff]  ;;  %v105_v51 = vld [vmem:[%s2626_s3 + $0xf8] sm:$0xff] }
   0xf   :  { %123 = vperm.xlu1 %1772, %v77_v14   ;;  %v1783_v50 = vld [vmem:[%s2629_s2 + $0x50] sm:$0xff]   ;;  %v89_v53 = vld [vmem:[%s2626_s3 + $0x78] sm:$0xff]  ;;  %v668_v56 = vld [vmem:[%s2631_s5] sm:$0xff] }
  0x10   :  { %v1838_v17 = vpop.eup %1837  ;;  %v88_v52 = vld [vmem:[%s2626_s3 + $0x70] sm:$0xff]  ;;  %v1784_v55 = vld [vmem:[%s2629_s2 + $0x58] sm:$0xff]   ;;  %v1785_v57 = vld [vmem:[%s2629_s2 + $0x60] sm:$0xff]  }
  0x11   :  { %v1840_v18 = vpop.eup %1839  ;;  %v39_v19 = vmul.f32 %v1838_v17, %v33_v6  ;;  %v669_v58 = vld [vmem:[%s2631_s5 + $0x8] sm:$0xff]  ;;  %v670_v59 = vld [vmem:[%s2631_s5 + $0x10] sm:$0xff]  ;;  %v671_v60 = vld [vmem:[%s2631_s5 + $0x18] sm:$0xff] }
  0x12   :  { %208 = vperm.xlu0 %1771, %v94_v15   ;;  %v36_v20 = vmul.f32 %v1840_v18, %v32_v5  ;;  %v1786_v61 = vld [vmem:[%s2629_s2 + $0x68] sm:$0xff]   ;;  %v672_v62 = vld [vmem:[%s2631_s5 + $0x20] sm:$0xff]  ;;  %v1787_v63 = vld [vmem:[%s2629_s2 + $0x70] sm:$0xff]  }
  0x13   :  { %213 = vperm.xlu1 %1772, %v95_v16   ;;  %v673_v0 = vld [vmem:[%s2631_s5 + $0x28] sm:$0xff]  ;;  %v674_v1 = vld [vmem:[%s2631_s5 + $0x30] sm:$0xff]  ;;  %v675_v2 = vld [vmem:[%s2631_s5 + $0x38] sm:$0xff] }
  0x14   :  { %v41_v22 = vpack.c.bf16 %v39_v19, %v36_v20  ;;  %v1788_v3 = vld [vmem:[%s2629_s2 + $0x78] sm:$0xff]   ;;  %v676_v4 = vld [vmem:[%s2631_s5 + $0x40] sm:$0xff]  ;;  %v677_v5 = vld [vmem:[%s2631_s5 + $0x48] sm:$0xff] }
  0x15   :  { %v678_v6 = vld [vmem:[%s2631_s5 + $0x50] sm:$0xff]  ;;  %v679_v7 = vld [vmem:[%s2631_s5 + $0x58] sm:$0xff]  ;;  %v680_v8 = vld [vmem:[%s2631_s5 + $0x60] sm:$0xff] }
  0x16   :  { %1720 = vmatprep.subr.bf16.mxu0 %v41_v22  ;;  %128 = vperm.xlu0 %1771, %v78_v21   ;;  %v681_v9 = vld [vmem:[%s2631_s5 + $0x68] sm:$0xff]  ;;  %v682_v10 = vld [vmem:[%s2631_s5 + $0x70] sm:$0xff]  ;;  %v683_v11 = vld [vmem:[%s2631_s5 + $0x78] sm:$0xff] }
  0x17   :  { %1721 = vmatpush3.bf16.msra.mxu0 %v41_v22  ;;  %133 = vperm.xlu1 %1772, %v79_v23   ;;  %v684_v12 = vld [vmem:[%s2631_s5 + $0x80] sm:$0xff]  ;;  %v685_v13 = vld [vmem:[%s2631_s5 + $0x88] sm:$0xff]  ;;  %v686_v14 = vld [vmem:[%s2631_s5 + $0x90] sm:$0xff] }
  0x18   :  { %v687_v15 = vld [vmem:[%s2631_s5 + $0x98] sm:$0xff]  ;;  %v688_v16 = vld [vmem:[%s2631_s5 + $0xa0] sm:$0xff]  ;;  %v689_v17 = vld [vmem:[%s2631_s5 + $0xa8] sm:$0xff] }
  0x19   :  { %v690_v18 = vld [vmem:[%s2631_s5 + $0xb0] sm:$0xff]  ;;  %v691_v19 = vld [vmem:[%s2631_s5 + $0xb8] sm:$0xff]  ;;  %v692_v20 = vld [vmem:[%s2631_s5 + $0xc0] sm:$0xff] }
  0x1a   :  { %1723 = vmatmul.mubr.msk.bf16.vlgmr.msra.gmra.mrb[0].mxu0 %vm346_vm0, %v1774_v24  ;;  %218 = vperm.xlu0 %1771, %v96_v25   ;;  %v693_v21 = vld [vmem:[%s2631_s5 + $0xc8] sm:$0xff]  ;;  %v694_v22 = vld [vmem:[%s2631_s5 + $0xd0] sm:$0xff]  ;;  %v695_v23 = vld [vmem:[%s2631_s5 + $0xd8] sm:$0xff] }
  0x1b   :  { %223 = vperm.xlu1 %1772, %v97_v27   ;;  %1726 = vmatprep.mubr.msk.bf16.mxu0 %vm346_vm0, %v1775_v26  ;;  %v696_v24 = vld [vmem:[%s2631_s5 + $0xe0] sm:$0xff]  ;;  %v697_v25 = vld [vmem:[%s2631_s5 + $0xe8] sm:$0xff]  ;;  %v698_v26 = vld [vmem:[%s2631_s5 + $0xf0] sm:$0xff] }
  0x1c   :  { %v699_v27 = vld [vmem:[%s2631_s5 + $0xf8] sm:$0xff]  ;;  %v1269_v54 = vld [vmem:[%s2632_s6 + $0xc0] sm:$0xff] }
  0x1e   :  { %138 = vperm.xlu0 %1771, %v80_v28   ;;  %v1245_v28 = vld [vmem:[%s2632_s6] sm:$0xff] }
  0x1f   :  { %143 = vperm.xlu1 %1772, %v81_v29   ;;  %v1246_v29 = vld [vmem:[%s2632_s6 + $0x8] sm:$0xff] }
  0x22   :  { %1727 = vmatmul.mubr.msk.bf16.gmra.mrb[4].mxu0 %vm346_vm0, %v1776_v30  ;;  %228 = vperm.xlu0 %1771, %v98_v31   ;;  %v1247_v30 = vld [vmem:[%s2632_s6 + $0x10] sm:$0xff]  ;;  %v1248_v31 = vld [vmem:[%s2632_s6 + $0x18] sm:$0xff] }
  0x23   :  { %233 = vperm.xlu1 %1772, %v99_v33   ;;  %1730 = vmatprep.mubr.msk.bf16.mxu0 %vm346_vm0, %v1777_v32  ;;  %v1249_v32 = vld [vmem:[%s2632_s6 + $0x20] sm:$0xff]  ;;  %v1250_v33 = vld [vmem:[%s2632_s6 + $0x28] sm:$0xff] }
  0x26   :  { %148 = vperm.xlu0 %1771, %v82_v34   ;;  %v1251_v34 = vld [vmem:[%s2632_s6 + $0x30] sm:$0xff] }
  0x27   :  { %153 = vperm.xlu1 %1772, %v83_v35   ;;  %v1252_v35 = vld [vmem:[%s2632_s6 + $0x38] sm:$0xff] }
  0x2a   :  { %1731 = vmatmul.mubr.msk.bf16.gmra.mrb[8].mxu0 %vm346_vm0, %v1778_v36  ;;  %238 = vperm.xlu0 %1771, %v100_v37   ;;  %v1253_v36 = vld [vmem:[%s2632_s6 + $0x40] sm:$0xff]  ;;  %v1254_v37 = vld [vmem:[%s2632_s6 + $0x48] sm:$0xff] }
  0x2b   :  { %243 = vperm.xlu1 %1772, %v101_v39   ;;  %1734 = vmatprep.mubr.msk.bf16.mxu0 %vm346_vm0, %v1779_v38  ;;  %v1255_v38 = vld [vmem:[%s2632_s6 + $0x50] sm:$0xff]  ;;  %v1256_v39 = vld [vmem:[%s2632_s6 + $0x58] sm:$0xff] }
  0x2e   :  { %158 = vperm.xlu0 %1771, %v84_v40   ;;  %v1257_v40 = vld [vmem:[%s2632_s6 + $0x60] sm:$0xff] }
  0x2f   :  { %163 = vperm.xlu1 %1772, %v85_v41   ;;  %v1258_v41 = vld [vmem:[%s2632_s6 + $0x68] sm:$0xff] }
  0x32   :  { %1735 = vmatmul.mubr.msk.bf16.gmra.mrb[12].mxu0 %vm346_vm0, %v1780_v42  ;;  %248 = vperm.xlu0 %1771, %v102_v43   ;;  %v1259_v42 = vld [vmem:[%s2632_s6 + $0x70] sm:$0xff]  ;;  %v1260_v43 = vld [vmem:[%s2632_s6 + $0x78] sm:$0xff] }
  0x33   :  { %253 = vperm.xlu1 %1772, %v103_v45   ;;  %1738 = vmatprep.mubr.msk.bf16.mxu0 %vm346_vm0, %v1781_v44  ;;  %v1261_v44 = vld [vmem:[%s2632_s6 + $0x80] sm:$0xff]  ;;  %v1262_v45 = vld [vmem:[%s2632_s6 + $0x88] sm:$0xff] }
  0x36   :  { %168 = vperm.xlu0 %1771, %v86_v46   ;;  %v1263_v46 = vld [vmem:[%s2632_s6 + $0x90] sm:$0xff] }
  0x37   :  { %173 = vperm.xlu1 %1772, %v87_v47   ;;  %v1264_v47 = vld [vmem:[%s2632_s6 + $0x98] sm:$0xff] }
  0x3a   :  { %1739 = vmatmul.mubr.msk.bf16.gmra.mrb[16].mxu0 %vm346_vm0, %v1782_v48  ;;  %258 = vperm.xlu0 %1771, %v104_v49   ;;  %v1265_v48 = vld [vmem:[%s2632_s6 + $0xa0] sm:$0xff]  ;;  %v1266_v49 = vld [vmem:[%s2632_s6 + $0xa8] sm:$0xff] }
  0x3b   :  { %263 = vperm.xlu1 %1772, %v105_v51   ;;  %1742 = vmatprep.mubr.msk.bf16.mxu0 %vm346_vm0, %v1783_v50  ;;  %v1267_v51 = vld [vmem:[%s2632_s6 + $0xb0] sm:$0xff] }
  0x3e   :  { %178 = vperm.xlu0 %1771, %v88_v52   ;;  %v1268_v52 = vld [vmem:[%s2632_s6 + $0xb8] sm:$0xff] }
  0x3f   :  { %183 = vperm.xlu1 %1772, %v89_v53  }
  0x42   :  { %1743 = vmatmul.mubr.msk.bf16.gmra.mrb[20].mxu0 %vm346_vm0, %v1784_v55  ;;  %702 = vperm.xlu0 %1771, %v668_v56   ;;  %v1270_v55 = vld [vmem:[%s2632_s6 + $0xc8] sm:$0xff] }
  0x43   :  { %707 = vperm.xlu1 %1772, %v669_v58   ;;  %1746 = vmatprep.mubr.msk.bf16.mxu0 %vm346_vm0, %v1785_v57  ;;  %v1271_v58 = vld [vmem:[%s2632_s6 + $0xd0] sm:$0xff] }
  0x46   :  { %712 = vperm.xlu0 %1771, %v670_v59   ;;  %v1272_v59 = vld [vmem:[%s2632_s6 + $0xd8] sm:$0xff] }
  0x47   :  { %717 = vperm.xlu1 %1772, %v671_v60   ;;  %v1273_v60 = vld [vmem:[%s2632_s6 + $0xe0] sm:$0xff] }
  0x4a   :  { %1747 = vmatmul.mubr.msk.bf16.gmra.mrb[24].mxu0 %vm346_vm0, %v1786_v61  ;;  %722 = vperm.xlu0 %1771, %v672_v62   ;;  %v1791_v62 = vld [vmem:[%s2633_s4 + $0x54] ss:$8 sps:$4 sm:$0xff]  }
  0x4b   :  { %727 = vperm.xlu1 %1772, %v673_v0   ;;  %1750 = vmatprep.mubr.msk.bf16.mxu0 %vm346_vm0, %v1787_v63  ;;  %v1274_v63 = vld [vmem:[%s2632_s6 + $0xe8] sm:$0xff] }
  0x4c   :  { %v1794_v0 = vld [vmem:[%s2633_s4 + $0x4] ss:$8 sps:$4 sm:$0xff]   ;;  %1092 = vmatprep.mubr.bf16.mxu1 %v1791_v62 }
  0x4e   :  { %732 = vperm.xlu0 %1771, %v674_v1  }
  0x4f   :  { %737 = vperm.xlu1 %1772, %v675_v2   ;;  %v1275_v2 = vld [vmem:[%s2632_s6 + $0xf0] sm:$0xff] }
  0x52   :  { %1751 = vmatmul.mubr.msk.bf16.gmra.mrb[28].mxu0 %vm346_vm0, %v1788_v3  ;;  %742 = vperm.xlu0 %1771, %v676_v4   ;;  %v1276_v3 = vld [vmem:[%s2632_s6 + $0xf8] sm:$0xff] }
  0x53   :  { %747 = vperm.xlu1 %1772, %v677_v5   ;;  %1052 = vmatprep.mubr.bf16.mxu0 %v1794_v0 }
  0x56   :  { %752 = vperm.xlu0 %1771, %v678_v6   ;;  %v1586_v6 = vld [vmem:[#allocation2] ss:$0 sm:$0xff] }
  0x57   :  { %757 = vperm.xlu1 %1772, %v679_v7  }
  0x5a   :  { %762 = vperm.xlu0 %1771, %v680_v8  }
  0x5b   :  { %767 = vperm.xlu1 %1772, %v681_v9  }
  0x5e   :  { %772 = vperm.xlu0 %1771, %v682_v10  }
  0x5f   :  { %777 = vperm.xlu1 %1772, %v683_v11  }
  0x62   :  { %782 = vperm.xlu0 %1771, %v684_v12  }
  0x63   :  { %787 = vperm.xlu1 %1772, %v685_v13  }
  0x66   :  { %792 = vperm.xlu0 %1771, %v686_v14  }
  0x67   :  { %797 = vperm.xlu1 %1772, %v687_v15  }
  0x6a   :  { %802 = vperm.xlu0 %1771, %v688_v16  }
  0x6b   :  { %807 = vperm.xlu1 %1772, %v689_v17  }
  0x6e   :  { %812 = vperm.xlu0 %1771, %v690_v18  }
  0x6f   :  { %817 = vperm.xlu1 %1772, %v691_v19  }
  0x72   :  { %822 = vperm.xlu0 %1771, %v692_v20  }
  0x73   :  { %827 = vperm.xlu1 %1772, %v693_v21  }
  0x76   :  { %832 = vperm.xlu0 %1771, %v694_v22  }
  0x77   :  { %837 = vperm.xlu1 %1772, %v695_v23  }
  0x7a   :  { %842 = vperm.xlu0 %1771, %v696_v24  }
  0x7b   :  { %847 = vperm.xlu1 %1772, %v697_v25  }
  0x7e   :  { %852 = vperm.xlu0 %1771, %v698_v26  }
  0x7f   :  { %857 = vperm.xlu1 %1772, %v699_v27  }
  0x81   :  { %v2222_v50 = vpop.permute.xlu0 %188 }
  0x82   :  { %1279 = vperm.xlu0 %1771, %v1245_v28   ;;  %v109_v53 = vpop.permute.xlu1 %108 }
  0x83   :  { %1284 = vperm.xlu1 %1772, %v1246_v29  }
  0x85   :  { %v2236_v56 = vpop.permute.xlu0 %193 }
  0x86   :  { %1289 = vperm.xlu0 %1771, %v1247_v30   ;;  %v114_v57 = vpop.permute.xlu1 %113 }
  0x87   :  { %1294 = vperm.xlu1 %1772, %v1248_v31  }
  0x89   :  { %v2247_v61 = vpop.permute.xlu0 %198 }
  0x8a   :  { %1299 = vperm.xlu0 %1771, %v1249_v32   ;;  %v2258_v1 = vpop.permute.xlu1 %203 }
  0x8b   :  { %1304 = vperm.xlu1 %1772, %v1250_v33  }
  0x8d   :  { %v119_v4 = vpop.permute.xlu0 %118 }
  0x8e   :  { %1309 = vperm.xlu0 %1771, %v1251_v34   ;;  %v124_v5 = vpop.permute.xlu1 %123 }
  0x8f   :  { %1314 = vperm.xlu1 %1772, %v1252_v35  }
  0x91   :  { %v2266_v7 = vpop.permute.xlu0 %208 }
  0x92   :  { %1319 = vperm.xlu0 %1771, %v1253_v36   ;;  %v2268_v8 = vpop.permute.xlu1 %213 }
  0x93   :  { %1324 = vperm.xlu1 %1772, %v1254_v37  }
  0x95   :  { %v129_v9 = vpop.permute.xlu0 %128 }
  0x96   :  { %1329 = vperm.xlu0 %1771, %v1255_v38   ;;  %v134_v10 = vpop.permute.xlu1 %133 }
  0x97   :  { %1334 = vperm.xlu1 %1772, %v1256_v39  }
  0x99   :  { %v2270_v11 = vpop.permute.xlu0 %218 }
  0x9a   :  { %1339 = vperm.xlu0 %1771, %v1257_v40   ;;  %v2272_v12 = vpop.permute.xlu1 %223 }
  0x9b   :  { %1344 = vperm.xlu1 %1772, %v1258_v41  }
  0x9d   :  { %v139_v13 = vpop.permute.xlu0 %138 }
  0x9e   :  { %1349 = vperm.xlu0 %1771, %v1259_v42   ;;  %v144_v14 = vpop.permute.xlu1 %143 }
  0x9f   :  { %1354 = vperm.xlu1 %1772, %v1260_v43  }
  0xa1   :  { %v2274_v15 = vpop.permute.xlu0 %228 }
  0xa2   :  { %1359 = vperm.xlu0 %1771, %v1261_v44   ;;  %v2276_v16 = vpop.permute.xlu1 %233 }
  0xa3   :  { %1364 = vperm.xlu1 %1772, %v1262_v45  }
  0xa5   :  { %v149_v17 = vpop.permute.xlu0 %148 }
  0xa6   :  { %1369 = vperm.xlu0 %1771, %v1263_v46   ;;  %v154_v18 = vpop.permute.xlu1 %153 }
  0xa7   :  { %1374 = vperm.xlu1 %1772, %v1264_v47  }
  0xa9   :  { %v2278_v19 = vpop.permute.xlu0 %238 }
  0xaa   :  { %1379 = vperm.xlu0 %1771, %v1265_v48   ;;  %v2280_v20 = vpop.permute.xlu1 %243 }
  0xab   :  { %1384 = vperm.xlu1 %1772, %v1266_v49  }
  0xad   :  { %v159_v21 = vpop.permute.xlu0 %158 }
  0xae   :  { %1389 = vperm.xlu0 %1771, %v1267_v51   ;;  %v164_v25 = vpop.permute.xlu1 %163 }
  0xaf   :  { %1394 = vperm.xlu1 %1772, %v1268_v52  }
  0xb1   :  { %v2282_v34 = vpop.permute.xlu0 %248 }
  0xb2   :  { %1399 = vperm.xlu0 %1771, %v1269_v54   ;;  %v2284_v38 = vpop.permute.xlu1 %253 }
  0xb3   :  { %1404 = vperm.xlu1 %1772, %v1270_v55  }
  0xb5   :  { %v169_v52 = vpop.permute.xlu0 %168 }
  0xb6   :  { %1409 = vperm.xlu0 %1771, %v1271_v58  }
  0xb7   :  { %1414 = vperm.xlu1 %1772, %v1272_v59  }
  0xba   :  { %1419 = vperm.xlu0 %1771, %v1273_v60  }
  0xbb   :  { %1424 = vperm.xlu1 %1772, %v1274_v63  }
  0xbe   :  { %1429 = vperm.xlu0 %1771, %v1275_v2  }
  0xbf   :  { %1434 = vperm.xlu1 %1772, %v1276_v3  }
  0xc2   :  { %1507 = vperm.xlu0 %1771, %v1586_v6  }
  0xed   :  { %v1724_v22 = vpop.f32.mrb[0].mxu0 }
  0xee   :  { %v438_v23 = vadd.f32 %v1724_v22, %v119_v4  ;;  %v429_v24 = vpop.f32.mrb[1].mxu0 }
  0xef   :  { %v430_v26 = vadd.f32 %v429_v24, %v109_v53  ;;  %v1725_v27 = vpop.f32.mrb[2].mxu0 }
  0xf0   :  { %v558_v28 = vmul.f32 0.2, %v438_v23  ;;  %v441_v29 = vadd.f32 %v1725_v27, %v124_v5  ;;  %v432_v30 = vpop.f32.mrb[3].mxu0  ;;  %v2292_v5 = vpop.permute.xlu0 %258 }
  0xf1   :  { %v556_v31 = vmul.f32 0.2, %v430_v26  ;;  %v433_v32 = vadd.f32 %v432_v30, %v114_v57  ;;  %v174_v57 = vpop.permute.xlu1 %173 }
  0xf2   :  { %v559_v33 = vmul.f32 0.2, %v441_v29  ;;  %v590_v36 = vmax.f32 %v438_v23, %v558_v28 }
  0xf3   :  { %v557_v35 = vmul.f32 0.2, %v433_v32  ;;  %v588_v39 = vmax.f32 %v430_v26, %v556_v31 }
  0xf4   :  { %v591_v37 = vmax.f32 %v441_v29, %v559_v33  ;;  %v179_v31 = vpop.permute.xlu0 %178 }
  0xf5   :  { %v589_v40 = vmax.f32 %v433_v32, %v557_v35  ;;  %v1728_v41 = vpop.f32.mrb[4].mxu0  ;;  %v2296_v23 = vpop.permute.xlu1 %263 }
  0xf6   :  { %v2286_v42 = vpack.c.bf16 %v591_v37, %v590_v36  ;;  %v454_v43 = vadd.f32 %v1728_v41, %v139_v13  ;;  %v445_v44 = vpop.f32.mrb[5].mxu0 }
  0xf7   :  { %v2288_v45 = vpack.c.bf16 %v589_v40, %v588_v39  ;;  %v446_v46 = vadd.f32 %v445_v44, %v129_v9  ;;  %v1729_v47 = vpop.f32.mrb[6].mxu0 }
  0xf8   :  { %v562_v48 = vmul.f32 0.2, %v454_v43  ;;  %v457_v49 = vadd.f32 %v1729_v47, %v144_v14  ;;  %v448_v51 = vpop.f32.mrb[7].mxu0 }
  0xf9   :  { %v560_v53 = vmul.f32 0.2, %v446_v46  ;;  %v449_v54 = vadd.f32 %v448_v51, %v134_v10  ;;  %v184_v37 = vpop.permute.xlu1 %183 }
  0xfa   :  { %v563_v55 = vmul.f32 0.2, %v457_v49  ;;  %v594_v59 = vmax.f32 %v454_v43, %v562_v48 }
  0xfb   :  { %v561_v58 = vmul.f32 0.2, %v449_v54  ;;  %v592_v62 = vmax.f32 %v446_v46, %v560_v53 }
  0xfc   :  { %v595_v60 = vmax.f32 %v457_v49, %v563_v55 }
  0xfd   :  { %v593_v63 = vmax.f32 %v449_v54, %v561_v58  ;;  %v1732_v0 = vpop.f32.mrb[8].mxu0 }
  0xfe   :  { %v2290_v2 = vpack.c.bf16 %v595_v60, %v594_v59  ;;  %v470_v3 = vadd.f32 %v1732_v0, %v159_v21  ;;  %v461_v4 = vpop.f32.mrb[9].mxu0 }
  0xff   :  { %v2294_v6 = vpack.c.bf16 %v593_v63, %v592_v62  ;;  %v462_v9 = vadd.f32 %v461_v4, %v149_v17  ;;  %v1733_v13 = vpop.f32.mrb[10].mxu0 }
 0x100   :  { %v566_v14 = vmul.f32 0.2, %v470_v3  ;;  %v473_v10 = vadd.f32 %v1733_v13, %v164_v25  ;;  %v464_v22 = vpop.f32.mrb[11].mxu0 }
 0x101   :  { %v564_v24 = vmul.f32 0.2, %v462_v9  ;;  %v465_v26 = vadd.f32 %v464_v22, %v154_v18 }
 0x102   :  { %v567_v27 = vmul.f32 0.2, %v473_v10  ;;  %v598_v29 = vmax.f32 %v470_v3, %v566_v14 }
 0x103   :  { %v565_v28 = vmul.f32 0.2, %v465_v26  ;;  %v596_v21 = vmax.f32 %v462_v9, %v564_v24 }
 0x104   :  { %v599_v30 = vmax.f32 %v473_v10, %v567_v27 }
 0x105   :  { %v597_v32 = vmax.f32 %v465_v26, %v565_v28  ;;  %v1736_v33 = vpop.f32.mrb[12].mxu0 }
 0x106   :  { %v2298_v35 = vpack.c.bf16 %v599_v30, %v598_v29  ;;  %v486_v36 = vadd.f32 %v1736_v33, %v179_v31  ;;  %v477_v17 = vpop.f32.mrb[13].mxu0 }
 0x107   :  { %v2300_v39 = vpack.c.bf16 %v597_v32, %v596_v21  ;;  %v478_v25 = vadd.f32 %v477_v17, %v169_v52  ;;  %v1737_v40 = vpop.f32.mrb[14].mxu0 }
 0x108   :  { %v570_v41 = vmul.f32 0.2, %v486_v36  ;;  %v489_v43 = vadd.f32 %v1737_v40, %v184_v37  ;;  %v480_v18 = vpop.f32.mrb[15].mxu0 }
 0x109   :  { %v568_v44 = vmul.f32 0.2, %v478_v25  ;;  %v481_v46 = vadd.f32 %v480_v18, %v174_v57 }
 0x10a   :  { %v571_v47 = vmul.f32 0.2, %v489_v43  ;;  %v602_v49 = vmax.f32 %v486_v36, %v570_v41 }
 0x10b   :  { %v569_v48 = vmul.f32 0.2, %v481_v46  ;;  %v600_v53 = vmax.f32 %v478_v25, %v568_v44 }
 0x10c   :  { %v603_v51 = vmax.f32 %v489_v43, %v571_v47 }
 0x10d   :  { %v601_v54 = vmax.f32 %v481_v46, %v569_v48  ;;  %v1740_v55 = vpop.f32.mrb[16].mxu0 }
 0x10e   :  { %v2302_v58 = vpack.c.bf16 %v603_v51, %v602_v49  ;;  %v502_v59 = vadd.f32 %v1740_v55, %v2247_v61  ;;  %v493_v60 = vpop.f32.mrb[17].mxu0 }
 0x10f   :  { %v2305_v62 = vpack.c.bf16 %v601_v54, %v600_v53  ;;  %v494_v52 = vadd.f32 %v493_v60, %v2222_v50  ;;  %v1741_v63 = vpop.f32.mrb[18].mxu0 }
 0x110   :  { %v574_v0 = vmul.f32 0.2, %v502_v59  ;;  %v505_v57 = vadd.f32 %v1741_v63, %v2258_v1  ;;  %v496_v3 = vpop.f32.mrb[19].mxu0 }
 0x111   :  { %v572_v4 = vmul.f32 0.2, %v494_v52  ;;  %v497_v9 = vadd.f32 %v496_v3, %v2236_v56 }
 0x112   :  { %v575_v13 = vmul.f32 0.2, %v505_v57  ;;  %v606_v10 = vmax.f32 %v502_v59, %v574_v0 }
 0x113   :  { %v573_v14 = vmul.f32 0.2, %v497_v9  ;;  %v604_v24 = vmax.f32 %v494_v52, %v572_v4 }
 0x114   :  { %v607_v22 = vmax.f32 %v505_v57, %v575_v13 }
 0x115   :  { %v605_v26 = vmax.f32 %v497_v9, %v573_v14  ;;  %v1744_v61 = vpop.f32.mrb[20].mxu0 }
 0x116   :  { %v518_v27 = vadd.f32 %v1744_v61, %v2270_v11  ;;  %v509_v28 = vpop.f32.mrb[21].mxu0  ;;  %v629_v29 = vpack.c.bf16 %v607_v22, %v606_v10  ;;  %v1792_v10 = vld [vmem:[%s2633_s4] ss:$8 sps:$4 sm:$0xff]   ;;  %v1799_v22 = vld [vmem:[%s2633_s4 + $0x10] ss:$8 sps:$4 sm:$0xff]  }
 0x117   :  { %v510_v50 = vadd.f32 %v509_v28, %v2266_v7  ;;  %v1745_v30 = vpop.f32.mrb[22].mxu0  ;;  %v628_v31 = vpack.c.bf16 %v605_v26, %v604_v24  ;;  %v1801_v24 = vld [vmem:[%s2633_s4 + $0x24] ss:$8 sps:$4 sm:$0xff]   ;;  %v1803_v26 = vld [vmem:[%s2633_s4 + $0x74] ss:$8 sps:$4 sm:$0xff]  }
 0x118   :  { %v578_v1 = vmul.f32 0.2, %v518_v27  ;;  %v521_v21 = vadd.f32 %v1745_v30, %v2272_v12  ;;  %v512_v32 = vpop.f32.mrb[23].mxu0  ;;  %v1805_v61 = vld [vmem:[%s2633_s4 + $0x20] ss:$8 sps:$4 sm:$0xff]  }
 0x119   :  { %v576_v56 = vmul.f32 0.2, %v510_v50  ;;  %v513_v33 = vadd.f32 %v512_v32, %v2268_v8  ;;  %1606 = vmatprep.subr.bf16.mxu0 %v628_v31  ;;  %1754 = vmatprep.subr.bf16.mxu1 %v628_v31  ;;  %v1807_v28 = vld [vmem:[%s2633_s4 + $0x34] ss:$8 sps:$4 sm:$0xff]   ;;  %v1812_v30 = vld [vmem:[%s2633_s4 + $0x80] ss:$8 sps:$4 sm:$0xff]  }
 0x11a   :  { %v579_v36 = vmul.f32 0.2, %v521_v21  ;;  %1607 = vmatpush3.bf16.msra.mxu0 %v2288_v45  ;;  %1762 = vmatpush3.bf16.msra.mxu1 %v2288_v45  ;;  %v610_v7 = vmax.f32 %v518_v27, %v578_v1  ;;  %v1806_v27 = vld [vmem:[%s2633_s4 + $0x70] ss:$8 sps:$4 sm:$0xff]   ;;  %v1813_v31 = vld [vmem:[%s2633_s4 + $0x44] ss:$8 sps:$4 sm:$0xff]  }
 0x11b   :  { %v577_v11 = vmul.f32 0.2, %v513_v33  ;;  %1608 = vmatprep.subr.bf16.mxu0 %v629_v29  ;;  %1755 = vmatprep.subr.bf16.mxu1 %v629_v29  ;;  %v608_v37 = vmax.f32 %v510_v50, %v576_v56  ;;  %v1809_v29 = vld [vmem:[%s2633_s4 + $0x84] ss:$8 sps:$4 sm:$0xff]   ;;  %v1811_v50 = vld [vmem:[%s2633_s4 + $0x30] ss:$8 sps:$4 sm:$0xff]  }
 0x11c   :  { %v611_v17 = vmax.f32 %v521_v21, %v579_v36  ;;  %v1815_v1 = vld [vmem:[%s2633_s4 + $0x94] ss:$8 sps:$4 sm:$0xff]   ;;  %v1817_v21 = vld [vmem:[%s2633_s4 + $0x40] ss:$8 sps:$4 sm:$0xff]   ;;  %v1818_v32 = vld [vmem:[%s2633_s4 + $0x90] ss:$8 sps:$4 sm:$0xff]  }
 0x11d   :  { %v609_v25 = vmax.f32 %v513_v33, %v577_v11  ;;  %v1748_v40 = vpop.f32.mrb[24].mxu0  ;;  %v1819_v56 = vld [vmem:[%s2633_s4 + $0xa4] ss:$8 sps:$4 sm:$0xff]   ;;  %v1821_v33 = vld [vmem:[%s2633_s4 + $0xa0] ss:$8 sps:$4 sm:$0xff]  }
 0x11e   :  { %v534_v12 = vadd.f32 %v1748_v40, %v2278_v19  ;;  %v525_v41 = vpop.f32.mrb[25].mxu0  ;;  %1609 = vmatpush3.bf16.msra.mxu0 %v2286_v42  ;;  %1763 = vmatpush3.bf16.msra.mxu1 %v2286_v42  ;;  %v631_v8 = vpack.c.bf16 %v611_v17, %v610_v7  ;;  %v1822_v36 = vld [vmem:[%s2633_s4 + $0xb4] ss:$8 sps:$4 sm:$0xff]   ;;  %v1824_v11 = vld [vmem:[%s2633_s4 + $0xb0] ss:$8 sps:$4 sm:$0xff]  }
 0x11f   :  { %v526_v43 = vadd.f32 %v525_v41, %v2274_v15  ;;  %v1749_v18 = vpop.f32.mrb[26].mxu0  ;;  %v630_v45 = vpack.c.bf16 %v609_v25, %v608_v37  ;;  %v1825_v7 = vld [vmem:[%s2633_s4 + $0xc4] ss:$8 sps:$4 sm:$0xff]   ;;  %v1827_v17 = vld [vmem:[%s2633_s4 + $0xc0] ss:$8 sps:$4 sm:$0xff]  }
 0x120   :  { %v582_v44 = vmul.f32 0.2, %v534_v12  ;;  %v537_v46 = vadd.f32 %v1749_v18, %v2280_v20  ;;  %v528_v47 = vpop.f32.mrb[27].mxu0  ;;  %v1828_v37 = vld [vmem:[%s2633_s4 + $0xd4] ss:$8 sps:$4 sm:$0xff]   ;;  %v2430_v18 = vpop.permute.xlu1 %707 }
 0x121   :  { %v580_v48 = vmul.f32 0.2, %v526_v43  ;;  %v529_v49 = vadd.f32 %v528_v47, %v2276_v16  ;;  %1610 = vmatprep.subr.bf16.mxu0 %v630_v45  ;;  %1756 = vmatprep.subr.bf16.mxu1 %v630_v45  ;;  %v1830_v25 = vld [vmem:[%s2633_s4 + $0xd0] ss:$8 sps:$4 sm:$0xff]   ;;  %v1831_v40 = vld [vmem:[%s2633_s4 + $0xe4] ss:$8 sps:$4 sm:$0xff]  }
 0x122   :  { %v583_v19 = vmul.f32 0.2, %v537_v46  ;;  %1611 = vmatpush3.bf16.msra.mxu0 %v2294_v6  ;;  %1764 = vmatpush3.bf16.msra.mxu1 %v2294_v6  ;;  %v614_v15 = vmax.f32 %v534_v12, %v582_v44  ;;  %v1833_v12 = vld [vmem:[%s2633_s4 + $0xe0] ss:$8 sps:$4 sm:$0xff]   ;;  %v1834_v41 = vld [vmem:[%s2633_s4 + $0xf4] ss:$8 sps:$4 sm:$0xff]  }
 0x123   :  { %v581_v42 = vmul.f32 0.2, %v529_v49  ;;  %1612 = vmatprep.subr.bf16.mxu0 %v631_v8  ;;  %1757 = vmatprep.subr.bf16.mxu1 %v631_v8  ;;  %v612_v53 = vmax.f32 %v526_v43, %v580_v48  ;;  %v1836_v8 = vld [vmem:[%s2633_s4 + $0xf0] ss:$8 sps:$4 sm:$0xff]   ;;  %v2428_v43 = vpop.permute.xlu0 %702 }
 0x124   :  { %v615_v51 = vmax.f32 %v537_v46, %v583_v19  ;;  %v2434_v44 = vpop.permute.xlu1 %717 }
 0x125   :  { %v613_v54 = vmax.f32 %v529_v49, %v581_v42  ;;  %v1752_v55 = vpop.f32.mrb[28].mxu0 }
 0x126   :  { %v550_v20 = vadd.f32 %v1752_v55, %v2292_v5  ;;  %v541_v59 = vpop.f32.mrb[29].mxu0  ;;  %1613 = vmatpush3.bf16.msra.mxu0 %v2290_v2  ;;  %1765 = vmatpush3.bf16.msra.mxu1 %v2290_v2  ;;  %v633_v16 = vpack.c.bf16 %v615_v51, %v614_v15 }
 0x127   :  { %v542_v60 = vadd.f32 %v541_v59, %v2282_v34  ;;  %v1753_v52 = vpop.f32.mrb[30].mxu0  ;;  %v632_v6 = vpack.c.bf16 %v613_v54, %v612_v53  ;;  %v2432_v45 = vpop.permute.xlu0 %712 }
 0x128   :  { %v586_v63 = vmul.f32 0.2, %v550_v20  ;;  %v553_v0 = vadd.f32 %v1753_v52, %v2296_v23  ;;  %v544_v57 = vpop.f32.mrb[31].mxu0  ;;  %v2438_v47 = vpop.permute.xlu1 %727 }
 0x129   :  { %v584_v3 = vmul.f32 0.2, %v542_v60  ;;  %v545_v4 = vadd.f32 %v544_v57, %v2284_v38  ;;  %1614 = vmatprep.subr.bf16.mxu0 %v632_v6  ;;  %1758 = vmatprep.subr.bf16.mxu1 %v632_v6 }
 0x12a   :  { %v587_v5 = vmul.f32 0.2, %v553_v0  ;;  %1615 = vmatpush3.bf16.msra.mxu0 %v2300_v39  ;;  %1766 = vmatpush3.bf16.msra.mxu1 %v2300_v39  ;;  %v618_v34 = vmax.f32 %v550_v20, %v586_v63  ;;  %v1789_v39 = vld [vmem:[%s2633_s4 + $0x50] ss:$8 sps:$4 sm:$0xff]  }
 0x12b   :  { %v585_v2 = vmul.f32 0.2, %v545_v4  ;;  %1616 = vmatprep.subr.bf16.mxu0 %v633_v16  ;;  %1759 = vmatprep.subr.bf16.mxu1 %v633_v16  ;;  %v616_v13 = vmax.f32 %v542_v60, %v584_v3  ;;  %v2436_v46 = vpop.permute.xlu0 %722 }
 0x12c   :  { %v619_v9 = vmax.f32 %v553_v0, %v587_v5  ;;  %v2442_v49 = vpop.permute.xlu1 %737 }
 0x12d   :  { %v617_v14 = vmax.f32 %v545_v4, %v585_v2 }
 0x12e   :  { %1617 = vmatpush3.bf16.msra.mxu0 %v2298_v35  ;;  %1767 = vmatpush3.bf16.msra.mxu1 %v2298_v35  ;;  %v635_v23 = vpack.c.bf16 %v619_v9, %v618_v34  ;;  %v1795_v35 = vld [vmem:[%s2633_s4 + $0x14] ss:$8 sps:$4 sm:$0xff]  }
 0x12f   :  { %v634_v38 = vpack.c.bf16 %v617_v14, %v616_v13  ;;  %v2440_v48 = vpop.permute.xlu0 %732 }
 0x130   :  { %v2446_v42 = vpop.permute.xlu1 %747 }
 0x131   :  { %1618 = vmatprep.subr.bf16.mxu0 %v634_v38  ;;  %1760 = vmatprep.subr.bf16.mxu1 %v634_v38 }
 0x132   :  { %1619 = vmatpush3.bf16.msra.mxu0 %v2305_v62  ;;  %1768 = vmatpush3.bf16.msra.mxu1 %v2305_v62  ;;  %v1797_v62 = vld [vmem:[%s2633_s4 + $0x64] ss:$8 sps:$4 sm:$0xff]  }
 0x133   :  { %1620 = vmatprep.subr.bf16.mxu0 %v635_v23  ;;  %1761 = vmatprep.subr.bf16.mxu1 %v635_v23  ;;  %v2444_v19 = vpop.permute.xlu0 %742 }
 0x134   :  { %v2450_v51 = vpop.permute.xlu1 %757 }
 0x136   :  { %1621 = vmatpush3.bf16.msra.mxu0 %v2302_v58  ;;  %1769 = vmatpush3.bf16.msra.mxu1 %v2302_v58  ;;  %v1800_v58 = vld [vmem:[%s2633_s4 + $0x60] ss:$8 sps:$4 sm:$0xff]  }
 0x137   :  { %v2448_v15 = vpop.permute.xlu0 %752 }
 0x138   :  { %v2454_v54 = vpop.permute.xlu1 %767 }
 0x139   :  { %1053 = vmatmul.mubr.bf16.vlgmr.msra.gmra.mrb[32].mxu0 %v1792_v10  ;;  %1093 = vmatmul.mubr.bf16.vlgmr.msra.gmra.mrb[0].mxu1 %v1789_v39  ;;  %2635 = vst [vmem:[#allocation3_spill] sm:$0xff] %v2454_v54 }
 0x13a   :  { %1060 = vmatprep.mubr.bf16.mxu0 %v1795_v35  ;;  %1100 = vmatprep.mubr.bf16.mxu1 %v1797_v62 }
 0x13b   :  { %v2452_v53 = vpop.permute.xlu0 %762 }
 0x13c   :  { %v2458_v20 = vpop.permute.xlu1 %777 }
 0x13d   :  { %2637 = vst [vmem:[#allocation5_spill] sm:$0xff] %v2458_v20 }
 0x13f   :  { %v2456_v55 = vpop.permute.xlu0 %772 }
 0x140   :  { %2636 = vst [vmem:[#allocation4_spill] sm:$0xff] %v2456_v55  ;;  %v2462_v16 = vpop.permute.xlu1 %787 }
 0x141   :  { %1061 = vmatmul.mubr.bf16.gmra.mrb[36].mxu0 %v1799_v22  ;;  %1101 = vmatmul.mubr.bf16.gmra.mrb[4].mxu1 %v1800_v58 }
 0x142   :  { %1068 = vmatprep.mubr.bf16.mxu0 %v1801_v24  ;;  %1108 = vmatprep.mubr.bf16.mxu1 %v1803_v26 }
 0x143   :  { %v2460_v59 = vpop.permute.xlu0 %782 }
 0x144   :  { %v2466_v52 = vpop.permute.xlu1 %797 }
 0x147   :  { %v2464_v60 = vpop.permute.xlu0 %792 }
 0x148   :  { %v2470_v63 = vpop.permute.xlu1 %807 }
 0x149   :  { %1069 = vmatmul.mubr.bf16.gmra.mrb[40].mxu0 %v1805_v61  ;;  %1109 = vmatmul.mubr.bf16.gmra.mrb[8].mxu1 %v1806_v27 }
 0x14a   :  { %1076 = vmatprep.mubr.bf16.mxu0 %v1807_v28  ;;  %1116 = vmatprep.mubr.bf16.mxu1 %v1809_v29 }
 0x14b   :  { %v2468_v6 = vpop.permute.xlu0 %802 }
 0x14c   :  { %v2474_v57 = vpop.permute.xlu1 %817 }
 0x14f   :  { %v2472_v0 = vpop.permute.xlu0 %812 }
 0x150   :  { %v2478_v4 = vpop.permute.xlu1 %827 }
 0x151   :  { %1077 = vmatmul.mubr.bf16.gmra.mrb[44].mxu0 %v1811_v50  ;;  %1117 = vmatmul.mubr.bf16.gmra.mrb[12].mxu1 %v1812_v30 }
 0x152   :  { %1084 = vmatprep.mubr.bf16.mxu0 %v1813_v31  ;;  %1124 = vmatprep.mubr.bf16.mxu1 %v1815_v1 }
 0x153   :  { %v2476_v3 = vpop.permute.xlu0 %822 }
 0x154   :  { %v2482_v2 = vpop.permute.xlu1 %837 }
 0x155   :  { %2638 = vst [vmem:[#allocation6_spill] sm:$0xff] %v2482_v2 }
 0x157   :  { %v2480_v5 = vpop.permute.xlu0 %832 }
 0x158   :  { %v2486_v9 = vpop.permute.xlu1 %847 }
 0x159   :  { %1085 = vmatmul.mubr.bf16.gmra.mrb[48].mxu0 %v1817_v21  ;;  %1125 = vmatmul.mubr.bf16.gmra.mrb[16].mxu1 %v1818_v32  ;;  %2640 = vst [vmem:[#allocation8_spill] sm:$0xff] %v2486_v9 }
 0x15a   :  { %1132 = vmatprep.mubr.bf16.mxu1 %v1819_v56 }
 0x15b   :  { %v2484_v34 = vpop.permute.xlu0 %842 }
 0x15c   :  { %2639 = vst [vmem:[#allocation7_spill] sm:$0xff] %v2484_v34  ;;  %v2490_v14 = vpop.permute.xlu1 %857 }
 0x15d   :  { %2642 = vst [vmem:[#allocation10_spill] sm:$0xff] %v2490_v14 }
 0x15f   :  { %v2488_v13 = vpop.permute.xlu0 %852 }
 0x160   :  { %2641 = vst [vmem:[#allocation9_spill] sm:$0xff] %v2488_v13  ;;  %v2494_v38 = vpop.permute.xlu1 %1284 }
 0x161   :  { %1133 = vmatmul.mubr.bf16.gmra.mrb[20].mxu1 %v1821_v33 }
 0x162   :  { %1140 = vmatprep.mubr.bf16.mxu1 %v1822_v36 }
 0x163   :  { %v2492_v23 = vpop.permute.xlu0 %1279 }
 0x164   :  { %v2498_v10 = vpop.permute.xlu1 %1294 }
 0x167   :  { %v2496_v39 = vpop.permute.xlu0 %1289 }
 0x168   :  { %v2502_v62 = vpop.permute.xlu1 %1304 }
 0x169   :  { %1141 = vmatmul.mubr.bf16.gmra.mrb[24].mxu1 %v1824_v11 }
 0x16a   :  { %1148 = vmatprep.mubr.bf16.mxu1 %v1825_v7 }
 0x16b   :  { %v2500_v35 = vpop.permute.xlu0 %1299 }
 0x16c   :  { %v2506_v58 = vpop.permute.xlu1 %1314 }
 0x16f   :  { %v2504_v22 = vpop.permute.xlu0 %1309 }
 0x170   :  { %v2510_v26 = vpop.permute.xlu1 %1324 }
 0x171   :  { %1149 = vmatmul.mubr.bf16.gmra.mrb[28].mxu1 %v1827_v17 }
 0x172   :  { %1156 = vmatprep.mubr.bf16.mxu1 %v1828_v37 }
 0x173   :  { %v2508_v24 = vpop.permute.xlu0 %1319 }
 0x174   :  { %v2518_v11 = vpop.permute.xlu1 %1334 }
 0x175   :  { %2644 = vst [vmem:[#allocation12_spill] sm:$0xff] %v2518_v11 }
 0x177   :  { %v2516_v36 = vpop.permute.xlu0 %1329 }
 0x178   :  { %2643 = vst [vmem:[#allocation11_spill] sm:$0xff] %v2516_v36 }
 0x179   :  { %1157 = vmatmul.mubr.bf16.gmra.mrb[32].mxu1 %v1830_v25 }
 0x17a   :  { %1164 = vmatprep.mubr.bf16.mxu1 %v1831_v40 }
 0x181   :  { %1165 = vmatmul.mubr.bf16.gmra.mrb[36].mxu1 %v1833_v12 }
 0x182   :  { %1172 = vmatprep.mubr.bf16.mxu1 %v1834_v41 }
 0x189   :  { %1173 = vmatmul.mubr.bf16.gmra.mrb[40].mxu1 %v1836_v8 }
 0x20c   :  { %v1622_v61 = vpop.f32.mrb[32].mxu0  ;;  %v1652_v27 = vpop.f32.mrb[0].mxu1 }
 0x20d   :  { %v1623_v28 = vpop.f32.mrb[33].mxu0  ;;  %v1653_v29 = vpop.f32.mrb[1].mxu1 }
 0x20e   :  { %v1624_v50 = vadd.f32 %v1623_v28, %v1622_v61  ;;  %v2512_v30 = vadd.f32 %v1653_v29, %v1652_v27  ;;  %v1625_v31 = vpop.f32.mrb[34].mxu0  ;;  %v1655_v1 = vpop.f32.mrb[2].mxu1 }
 0x20f   :  { %v1626_v21 = vpop.f32.mrb[35].mxu0  ;;  %v1656_v32 = vpop.f32.mrb[3].mxu1 }
 0x210   :  { %v1627_v56 = vadd.f32 %v1626_v21, %v1625_v31  ;;  %v2514_v33 = vadd.f32 %v1656_v32, %v1655_v1  ;;  %v2524_v31 = vpop.permute.xlu0 %1339  ;;  %v2526_v1 = vpop.permute.xlu1 %1344 }
 0x211   :  { %2647 = vst [vmem:[#allocation15_spill] sm:$0xff] %v2524_v31  ;;  %2648 = vst [vmem:[#allocation16_spill] sm:$0xff] %v2526_v1 }
 0x214   :  { %v1628_v7 = vpop.f32.mrb[36].mxu0  ;;  %v1658_v17 = vpop.f32.mrb[4].mxu1 }
 0x215   :  { %v1629_v37 = vpop.f32.mrb[37].mxu0  ;;  %v1659_v25 = vpop.f32.mrb[5].mxu1 }
 0x216   :  { %v1631_v40 = vpop.f32.mrb[38].mxu0  ;;  %v1661_v12 = vpop.f32.mrb[6].mxu1  ;;  %v1630_v41 = vadd.f32 %v1629_v37, %v1628_v7  ;;  %v2520_v8 = vadd.f32 %v1659_v25, %v1658_v17 }
 0x217   :  { %v1632_v61 = vpop.f32.mrb[39].mxu0  ;;  %v1662_v27 = vpop.f32.mrb[7].mxu1 }
 0x218   :  { %2645 = vst [vmem:[#allocation13_spill] sm:$0xff] %v2520_v8  ;;  %v1633_v28 = vadd.f32 %v1632_v61, %v1631_v40  ;;  %v2522_v29 = vadd.f32 %v1662_v27, %v1661_v12  ;;  %v1055_v40 = vadd.f32 %v1624_v50, %v2428_v43  ;;  %v2533_v12 = vpop.permute.xlu0 %1349  ;;  %v2535_v61 = vpop.permute.xlu1 %1354  ;;  %v1058_v27 = vadd.f32 %v1627_v56, %v2430_v18 }
 0x219   :  { %2651 = vst [vmem:[#allocation19_spill] sm:$0xff] %v2533_v12  ;;  %2652 = vst [vmem:[#allocation20_spill] sm:$0xff] %v2535_v61 }
 0x21a   :  { %2646 = vst [vmem:[#allocation14_spill] sm:$0xff] %v2522_v29  ;;  %v1066_v2 = vadd.f32 %v1633_v28, %v2434_v44 }
 0x21c   :  { %v1634_v21 = vpop.f32.mrb[40].mxu0  ;;  %v1664_v32 = vpop.f32.mrb[8].mxu1  ;;  %v1184_v28 = vmul.f32 0.2, %v1066_v2 }
 0x21d   :  { %v1635_v14 = vpop.f32.mrb[41].mxu0  ;;  %v1665_v13 = vpop.f32.mrb[9].mxu1 }
 0x21e   :  { %v1636_v20 = vadd.f32 %v1635_v14, %v1634_v21  ;;  %v2528_v9 = vadd.f32 %v1665_v13, %v1664_v32  ;;  %v1637_v55 = vpop.f32.mrb[42].mxu0  ;;  %v1667_v7 = vpop.f32.mrb[10].mxu1  ;;  %v1181_v21 = vmul.f32 0.2, %v1055_v40 }
 0x21f   :  { %v1638_v17 = vpop.f32.mrb[43].mxu0  ;;  %v1668_v37 = vpop.f32.mrb[11].mxu1 }
 0x220   :  { %2649 = vst [vmem:[#allocation17_spill] sm:$0xff] %v2528_v9  ;;  %v1639_v25 = vadd.f32 %v1638_v17, %v1637_v55  ;;  %v2530_v34 = vadd.f32 %v1668_v37, %v1667_v7  ;;  %v1182_v37 = vmul.f32 0.2, %v1058_v27  ;;  %v1213_v12 = vmax.f32 %v1055_v40, %v1181_v21  ;;  %v1365_v36 = vpop.permute.xlu1 %1364 }
 0x222   :  { %2650 = vst [vmem:[#allocation18_spill] sm:$0xff] %v2530_v34  ;;  %v1360_v34 = vpop.permute.xlu0 %1359 }
 0x224   :  { %v1640_v1 = vpop.f32.mrb[44].mxu0  ;;  %v1670_v31 = vpop.f32.mrb[12].mxu1 }
 0x225   :  { %v1641_v14 = vpop.f32.mrb[45].mxu0  ;;  %v1671_v13 = vpop.f32.mrb[13].mxu1 }
 0x226   :  { %v2538_v32 = vadd.f32 %v1641_v14, %v1640_v1  ;;  %v1672_v9 = vadd.f32 %v1671_v13, %v1670_v31  ;;  %v1643_v11 = vpop.f32.mrb[46].mxu0  ;;  %v1673_v55 = vpop.f32.mrb[14].mxu1  ;;  %v1063_v1 = vadd.f32 %v1630_v41, %v2432_v45  ;;  %v1214_v14 = vmax.f32 %v1058_v27, %v1182_v37 }
 0x227   :  { %v1644_v7 = vpop.f32.mrb[47].mxu0  ;;  %v1674_v17 = vpop.f32.mrb[15].mxu1 }
 0x228   :  { %v1119_v43 = vadd.f32 %v1672_v9, %v2460_v59  ;;  %v2541_v50 = vadd.f32 %v1644_v7, %v1643_v11  ;;  %v1675_v61 = vadd.f32 %v1674_v17, %v1673_v55  ;;  %v1437_v9 = vmul.f32 %v2492_v23, %v1213_v12 }
 0x229   :  { %v1438_v27 = vmul.f32 %v2494_v38, %v1214_v14  ;;  %v1216_v38 = vmax.f32 %v1066_v2, %v1184_v28  ;;  %v1079_v2 = vadd.f32 %v2538_v32, %v2440_v48 }
 0x22a   :  { %v1197_v18 = vmul.f32 0.2, %v1119_v43  ;;  %v1122_v56 = vadd.f32 %v1675_v61, %v2462_v16  ;;  %v1183_v16 = vmul.f32 0.2, %v1063_v1 }
 0x22c   :  { %v1229_v31 = vmax.f32 %v1119_v43, %v1197_v18  ;;  %v1198_v13 = vmul.f32 0.2, %v1122_v56  ;;  %v1646_v29 = vpop.f32.mrb[48].mxu0  ;;  %v1676_v54 = vpop.f32.mrb[16].mxu1  ;;  %v1215_v18 = vmax.f32 %v1063_v1, %v1183_v16 }
 0x22d   :  { %v1647_v8 = vpop.f32.mrb[49].mxu0  ;;  %v1677_v59 = vpop.f32.mrb[17].mxu1 }
 0x22e   :  { %v1453_v11 = vmul.f32 %v1360_v34, %v1229_v31  ;;  %v1230_v40 = vmax.f32 %v1122_v56, %v1198_v13  ;;  %v1649_v21 = vpop.f32.mrb[50].mxu0  ;;  %v1679_v55 = vpop.f32.mrb[18].mxu1  ;;  %v2547_v61 = vadd.f32 %v1647_v8, %v1646_v29  ;;  %v1678_v7 = vadd.f32 %v1677_v59, %v1676_v54 }
 0x22f   :  { %v1650_v45 = vpop.f32.mrb[51].mxu0  ;;  %v1680_v41 = vpop.f32.mrb[19].mxu1  ;;  %v1071_v34 = vadd.f32 %v1636_v20, %v2436_v46  ;;  %v1074_v8 = vadd.f32 %v1639_v25, %v2438_v47 }
 0x230   :  { %v2550_v17 = vadd.f32 %v1453_v11, %v1437_v9  ;;  %v1454_v37 = vmul.f32 %v1365_v36, %v1230_v40  ;;  %v1651_v44 = vadd.f32 %v1650_v45, %v1649_v21  ;;  %v1127_v43 = vadd.f32 %v1678_v7, %v2464_v60  ;;  %v1370_v13 = vpop.permute.xlu0 %1369  ;;  %v1375_v21 = vpop.permute.xlu1 %1374 }
 0x231   :  { %v1681_v23 = vadd.f32 %v1680_v41, %v1679_v55  ;;  %v1185_v59 = vmul.f32 0.2, %v1071_v34  ;;  %v1439_v11 = vmul.f32 %v2496_v39, %v1215_v18  ;;  %v1186_v46 = vmul.f32 0.2, %v1074_v8 }
 0x232   :  { %v2554_v12 = vadd.f32 %v1454_v37, %v1438_v27  ;;  %v1199_v54 = vmul.f32 0.2, %v1127_v43  ;;  %v1082_v27 = vadd.f32 %v2541_v50, %v2442_v49 }
 0x233   :  { %v1130_v29 = vadd.f32 %v1681_v23, %v2466_v52  ;;  %v1440_v52 = vmul.f32 %v2498_v10, %v1216_v38  ;;  %v1217_v7 = vmax.f32 %v1071_v34, %v1185_v59  ;;  %v1218_v41 = vmax.f32 %v1074_v8, %v1186_v46 }
 0x234   :  { %v1682_v56 = vpop.f32.mrb[20].mxu1  ;;  %v1231_v14 = vmax.f32 %v1127_v43, %v1199_v54  ;;  %v1380_v10 = vpop.permute.xlu0 %1379  ;;  %v1187_v23 = vmul.f32 0.2, %v1079_v2  ;;  %v1188_v8 = vmul.f32 0.2, %v1082_v27 }
 0x235   :  { %v1200_v31 = vmul.f32 0.2, %v1130_v29  ;;  %v1683_v36 = vpop.f32.mrb[21].mxu1  ;;  %v1441_v48 = vmul.f32 %v2500_v35, %v1217_v7 }
 0x236   :  { %v1684_v9 = vadd.f32 %v1683_v36, %v1682_v56  ;;  %v1685_v60 = vpop.f32.mrb[22].mxu1  ;;  %v1455_v20 = vmul.f32 %v1370_v13, %v1231_v14  ;;  %v1385_v56 = vpop.permute.xlu1 %1384  ;;  %v1219_v36 = vmax.f32 %v1079_v2, %v1187_v23  ;;  %v1087_v13 = vadd.f32 %v2547_v61, %v2444_v19 }
 0x237   :  { %v1232_v40 = vmax.f32 %v1130_v29, %v1200_v31  ;;  %v1686_v1 = vpop.f32.mrb[23].mxu1 }
 0x238   :  { %v1135_v47 = vadd.f32 %v1684_v9, %v2468_v6  ;;  %v1687_v25 = vadd.f32 %v1686_v1, %v1685_v60  ;;  %v2563_v55 = vadd.f32 %v1455_v20, %v1439_v11  ;;  %v1220_v60 = vmax.f32 %v1082_v27, %v1188_v8 }
 0x239   :  { %v1456_v16 = vmul.f32 %v1375_v21, %v1232_v40  ;;  %v1390_v40 = vpop.permute.xlu0 %1389  ;;  %v1443_v1 = vmul.f32 %v2504_v22, %v1219_v36  ;;  %v1189_v21 = vmul.f32 0.2, %v1087_v13  ;;  %v1095_v22 = vadd.f32 %v2512_v30, %v2448_v15 }
 0x23a   :  { %v1201_v45 = vmul.f32 0.2, %v1135_v47  ;;  %v1138_v39 = vadd.f32 %v1687_v25, %v2470_v63  ;;  %v1442_v63 = vmul.f32 %v2502_v62, %v1218_v41  ;;  %v1090_v62 = vadd.f32 %v1651_v44, %v2446_v42  ;;  %v1395_v61 = vpop.permute.xlu1 %1394 }
 0x23b   :  { %v2568_v37 = vadd.f32 %v1456_v16, %v1440_v52  ;;  %v1444_v2 = vmul.f32 %v2506_v58, %v1220_v60  ;;  %v1098_v58 = vadd.f32 %v2514_v33, %v2450_v51 }
 0x23c   :  { %v1233_v6 = vmax.f32 %v1135_v47, %v1201_v45  ;;  %v1202_v28 = vmul.f32 0.2, %v1138_v39  ;;  %v1688_v43 = vpop.f32.mrb[24].mxu1  ;;  %v1190_v16 = vmul.f32 0.2, %v1090_v62 }
 0x23d   :  { %v1689_v18 = vpop.f32.mrb[25].mxu1 }
 0x23e   :  { %v1457_v32 = vmul.f32 %v1380_v10, %v1233_v6  ;;  %v1234_v54 = vmax.f32 %v1138_v39, %v1202_v28  ;;  %v1690_v34 = vadd.f32 %v1689_v18, %v1688_v43  ;;  %v1691_v29 = vpop.f32.mrb[26].mxu1  ;;  %v1221_v39 = vmax.f32 %v1087_v13, %v1189_v21  ;;  %v1400_v18 = vpop.permute.xlu0 %1399 }
 0x23f   :  { %v1692_v38 = vpop.f32.mrb[27].mxu1  ;;  %v1222_v28 = vmax.f32 %v1090_v62, %v1190_v16  ;;  %v2655_v62 = vld [vmem:[#allocation3_spill] sm:$0xff] }
 0x240   :  { %v2572_v49 = vadd.f32 %v1457_v32, %v1441_v48  ;;  %v1458_v50 = vmul.f32 %v1385_v56, %v1234_v54  ;;  %v1143_v14 = vadd.f32 %v1690_v34, %v2472_v0  ;;  %v1693_v31 = vadd.f32 %v1692_v38, %v1691_v29  ;;  %v1405_v29 = vpop.permute.xlu1 %1404 }
 0x241   :  { %v1191_v48 = vmul.f32 0.2, %v1095_v22  ;;  %v1445_v32 = vmul.f32 %v2508_v24, %v1221_v39  ;;  %v1192_v56 = vmul.f32 0.2, %v1098_v58 }
 0x242   :  { %v2577_v35 = vadd.f32 %v1458_v50, %v1442_v63  ;;  %v1203_v59 = vmul.f32 0.2, %v1143_v14  ;;  %v1146_v9 = vadd.f32 %v1693_v31, %v2474_v57 }
 0x243   :  { %v1223_v50 = vmax.f32 %v1095_v22, %v1191_v48  ;;  %v1224_v60 = vmax.f32 %v1098_v58, %v1192_v56  ;;  %v2661_v58 = vld [vmem:[#allocation17_spill] sm:$0xff] }
 0x244   :  { %v1235_v11 = vmax.f32 %v1143_v14, %v1203_v59  ;;  %v1204_v46 = vmul.f32 0.2, %v1146_v9  ;;  %v1694_v20 = vpop.f32.mrb[28].mxu1  ;;  %v2653_v14 = vld [vmem:[#allocation13_spill] sm:$0xff]  ;;  %v2654_v59 = vld [vmem:[#allocation6_spill] sm:$0xff] }
 0x245   :  { %v1695_v0 = vpop.f32.mrb[29].mxu1  ;;  %v1103_v31 = vadd.f32 %v2653_v14, %v2452_v53 }
 0x246   :  { %v1459_v47 = vmul.f32 %v1390_v40, %v1235_v11  ;;  %v1236_v25 = vmax.f32 %v1146_v9, %v1204_v46  ;;  %v1696_v52 = vadd.f32 %v1695_v0, %v1694_v20  ;;  %v1697_v19 = vpop.f32.mrb[30].mxu1  ;;  %v2656_v11 = vld [vmem:[#allocation14_spill] sm:$0xff] }
 0x247   :  { %v1698_v57 = vpop.f32.mrb[31].mxu1  ;;  %v1193_v0 = vmul.f32 0.2, %v1103_v31 }
 0x248   :  { %v2583_v7 = vadd.f32 %v1459_v47, %v1443_v1  ;;  %v1460_v42 = vmul.f32 %v1395_v61, %v1236_v25  ;;  %v1151_v44 = vadd.f32 %v1696_v52, %v2476_v3  ;;  %v1699_v45 = vadd.f32 %v1698_v57, %v1697_v19  ;;  %v1410_v1 = vpop.permute.xlu0 %1409  ;;  %v2657_v47 = vld [vmem:[#allocation11_spill] sm:$0xff]  ;;  %v1415_v61 = vpop.permute.xlu1 %1414 }
 0x249   :  { %v1447_v53 = vmul.f32 %v2657_v47, %v1223_v50 }
 0x24a   :  { %v2588_v41 = vadd.f32 %v1460_v42, %v1444_v2  ;;  %v1205_v27 = vmul.f32 0.2, %v1151_v44  ;;  %v1154_v6 = vadd.f32 %v1699_v45, %v2478_v4  ;;  %v1446_v4 = vmul.f32 %v2510_v26, %v1222_v28  ;;  %v2658_v2 = vld [vmem:[#allocation12_spill] sm:$0xff] }
 0x24b   :  { %v1106_v26 = vadd.f32 %v2656_v11, %v2655_v62  ;;  %v1448_v16 = vmul.f32 %v2658_v2, %v1224_v60 }
 0x24c   :  { %v1237_v43 = vmax.f32 %v1151_v44, %v1205_v27  ;;  %v1206_v10 = vmul.f32 0.2, %v1154_v6  ;;  %v1700_v23 = vpop.f32.mrb[32].mxu1  ;;  %v1225_v27 = vmax.f32 %v1103_v31, %v1193_v0  ;;  %v1425_v31 = vpop.permute.xlu1 %1424  ;;  %v2668_v0 = vld [vmem:[#allocation10_spill] sm:$0xff] }
 0x24d   :  { %v1701_v3 = vpop.f32.mrb[33].mxu1  ;;  %v1194_v57 = vmul.f32 0.2, %v1106_v26 }
 0x24e   :  { %v1461_v54 = vmul.f32 %v1400_v18, %v1237_v43  ;;  %v1238_v15 = vmax.f32 %v1154_v6, %v1206_v10  ;;  %v1702_v30 = vadd.f32 %v1701_v3, %v1700_v23  ;;  %v1703_v34 = vpop.f32.mrb[34].mxu1  ;;  %v2660_v6 = vld [vmem:[#allocation4_spill] sm:$0xff] }
 0x24f   :  { %v1704_v63 = vpop.f32.mrb[35].mxu1  ;;  %v1111_v28 = vadd.f32 %v2661_v58, %v2660_v6  ;;  %v2662_v18 = vld [vmem:[#allocation8_spill] sm:$0xff]  ;;  %v1226_v3 = vmax.f32 %v1106_v26, %v1194_v57 }
 0x250   :  { %v1477_v8 = vadd.f32 %v1461_v54, %v1445_v32  ;;  %v1462_v51 = vmul.f32 %v1405_v29, %v1238_v15  ;;  %v1159_v33 = vadd.f32 %v1702_v30, %v2480_v5  ;;  %v1705_v38 = vadd.f32 %v1704_v63, %v1703_v34  ;;  %v2663_v32 = vld [vmem:[#allocation5_spill] sm:$0xff]  ;;  %v2664_v54 = vld [vmem:[#allocation18_spill] sm:$0xff] }
 0x251   :  { %v1114_v15 = vadd.f32 %v2664_v54, %v2663_v32  ;;  %v1195_v63 = vmul.f32 0.2, %v1111_v28 }
 0x252   :  { %v1485_v24 = vadd.f32 %v1477_v8, %v2550_v17  ;;  %v1478_v36 = vadd.f32 %v1462_v51, %v1446_v4  ;;  %v1207_v13 = vmul.f32 0.2, %v1159_v33  ;;  %v1162_v9 = vadd.f32 %v1705_v38, %v2654_v59  ;;  %v1420_v4 = vpop.permute.xlu0 %1419  ;;  %v2665_v51 = vld [vmem:[#allocation15_spill] sm:$0xff] }
 0x253   :  { %v1196_v59 = vmul.f32 0.2, %v1114_v15 }
 0x254   :  { %v1486_v46 = vadd.f32 %v1478_v36, %v2554_v12  ;;  %v1239_v20 = vmax.f32 %v1159_v33, %v1207_v13  ;;  %v1208_v40 = vmul.f32 0.2, %v1162_v9  ;;  %v1706_v5 = vpop.f32.mrb[36].mxu1  ;;  %v2659_v12 = vld [vmem:[#allocation7_spill] sm:$0xff]  ;;  %v1449_v33 = vmul.f32 %v2665_v51, %v1225_v27  ;;  %v2666_v36 = vld [vmem:[#allocation16_spill] sm:$0xff] }
 0x255   :  { %v1707_v21 = vpop.f32.mrb[37].mxu1  ;;  %v1450_v13 = vmul.f32 %v2666_v36, %v1226_v3  ;;  %v1228_v47 = vmax.f32 %v1114_v15, %v1196_v59 }
 0x256   :  { %v1463_v25 = vmul.f32 %v1410_v1, %v1239_v20  ;;  %v1240_v17 = vmax.f32 %v1162_v9, %v1208_v40  ;;  %v1708_v52 = vadd.f32 %v1707_v21, %v1706_v5  ;;  %v1709_v19 = vpop.f32.mrb[38].mxu1  ;;  %v1227_v20 = vmax.f32 %v1111_v28, %v1195_v63 }
 0x257   :  { %v1710_v42 = vpop.f32.mrb[39].mxu1 }
 0x258   :  { %v1479_v44 = vadd.f32 %v1463_v25, %v1447_v53  ;;  %v1464_v45 = vmul.f32 %v1415_v61, %v1240_v17  ;;  %v1167_v22 = vadd.f32 %v1708_v52, %v2659_v12  ;;  %v1711_v39 = vadd.f32 %v1710_v42, %v1709_v19  ;;  %v1430_v19 = vpop.permute.xlu0 %1429  ;;  %v2669_v61 = vld [vmem:[#allocation19_spill] sm:$0xff] }
 0x259   :  { %v1451_v2 = vmul.f32 %v2669_v61, %v1227_v20 }
 0x25a   :  { %v1487_v43 = vadd.f32 %v1479_v44, %v2563_v55  ;;  %v1480_v10 = vadd.f32 %v1464_v45, %v1448_v16  ;;  %v1209_v23 = vmul.f32 0.2, %v1167_v22  ;;  %v1170_v48 = vadd.f32 %v1711_v39, %v2662_v18  ;;  %v1435_v44 = vpop.permute.xlu1 %1434  ;;  %v2670_v45 = vld [vmem:[#allocation20_spill] sm:$0xff] }
 0x25b   :  { %v1452_v12 = vmul.f32 %v2670_v45, %v1228_v47 }
 0x25c   :  { %v1488_v30 = vadd.f32 %v1480_v10, %v2568_v37  ;;  %v1241_v34 = vmax.f32 %v1167_v22, %v1209_v23  ;;  %v1210_v29 = vmul.f32 0.2, %v1170_v48  ;;  %v1712_v56 = vpop.f32.mrb[40].mxu1  ;;  %v2667_v37 = vld [vmem:[#allocation9_spill] sm:$0xff]  ;;  %v1508_v23 = vpop.permute.xlu0 %1507 }
 0x25d   :  { %v1713_v8 = vpop.f32.mrb[41].mxu1 }
 0x25e   :  { %v1465_v38 = vmul.f32 %v1420_v4, %v1241_v34  ;;  %v1242_v55 = vmax.f32 %v1170_v48, %v1210_v29  ;;  %v1714_v50 = vadd.f32 %v1713_v8, %v1712_v56  ;;  %v1715_v14 = vpop.f32.mrb[42].mxu1 }
 0x25f   :  { %v1716_v9 = vpop.f32.mrb[43].mxu1 }
 0x260   :  { %v1481_v60 = vadd.f32 %v1465_v38, %v1449_v33  ;;  %v1466_v62 = vmul.f32 %v1425_v31, %v1242_v55  ;;  %v1175_v11 = vadd.f32 %v1714_v50, %v2667_v37  ;;  %v1717_v26 = vadd.f32 %v1716_v9, %v1715_v14 }
 0x262   :  { %v1489_v40 = vadd.f32 %v1481_v60, %v2572_v49  ;;  %v1482_v5 = vadd.f32 %v1466_v62, %v1450_v13  ;;  %v1211_v1 = vmul.f32 0.2, %v1175_v11  ;;  %v1178_v21 = vadd.f32 %v1717_v26, %v2668_v0 }
 0x264   :  { %v1493_v53 = vadd.f32 %v1489_v40, %v1485_v24  ;;  %v1490_v25 = vadd.f32 %v1482_v5, %v2577_v35  ;;  %v1243_v17 = vmax.f32 %v1175_v11, %v1211_v1  ;;  %v1212_v52 = vmul.f32 0.2, %v1178_v21 }
 0x266   :  { %v1494_v16 = vadd.f32 %v1490_v25, %v1486_v46  ;;  %v1467_v57 = vmul.f32 %v1430_v19, %v1243_v17  ;;  %v1244_v42 = vmax.f32 %v1178_v21, %v1212_v52 }
 0x268   :  { %v1483_v49 = vadd.f32 %v1467_v57, %v1451_v2  ;;  %v1468_v22 = vmul.f32 %v1435_v44, %v1244_v42 }
 0x26a   :  { %v1491_v39 = vadd.f32 %v1483_v49, %v2583_v7  ;;  %v1484_v27 = vadd.f32 %v1468_v22, %v1452_v12 }
 0x26c   :  { %v1495_v6 = vadd.f32 %v1491_v39, %v1487_v43  ;;  %v1492_v24 = vadd.f32 %v1484_v27, %v2588_v41 }
 0x26e   :  { %v1497_v35 = vadd.f32 %v1495_v6, %v1493_v53  ;;  %v1496_v58 = vadd.f32 %v1492_v24, %v1488_v30 }
 0x270   :  { %v1498_v28 = vadd.f32 %v1496_v58, %v1494_v16 }
 0x272   :  { %v1499_v10 = vadd.f32 %v1498_v28, %v1497_v35 }
 0x274   :  { %v1510_v18 = vadd.f32 %v1508_v23, %v1499_v10 }
 0x276   :  { %v1587_v46 = vmul.f32 -1.442695, %v1510_v18 }
 0x278   :  { %1841 = vpow2.f32 %v1587_v46 }
 0x282   :  { %v1842_v48 = vpop.eup %1841 }
 0x283   :  { %v1514_v3 = vadd.f32 1.0, %v1842_v48 }
 0x285   :  { %1843 = vrcp.f32 %v1514_v3 }
 0x28f   :  { %v1844_v32 = vpop.eup %1843 }
 0x290   :  { %1517 = vst [vmem:[%s2634_s8] sm:$0xff] %v1844_v32 }

</bundles_post_ra>
